<compile_context>
chip_gen: v7x
topology: tpu7x:2x2x1
jax: 0.10.0
libtpu: 0.0.40
codegen_flags: <defaults>
</compile_context>

<pallas_src>
import functools
import math

import jax
import jax.numpy as jnp
from jax.experimental import pallas as pl
from jax.experimental.pallas import tpu as pltpu


def _round_up(x, m):
    return (x + m - 1) // m * m


# --------------------------------------------------------------------------- kernel
def _encoder_kernel(data_ref, bid_ref, eps_ref,               # batch-tiled activations
                    wconv_ref, bconv_ref,                     # SMEM: folded conv taps
                    wfc_ref, bfc_ref, wmv_ref, bmv_ref,       # VMEM-resident weights
                    out_ref,                                  # packed lane-dense output
                    q_sc,                                     # (TB, C*L_pad) bf16 scratch
                    *, M, K, C, P, L_out, L_pad, D, OUT_W):
    d = data_ref[...]                                         # (TB, M, F) f32
    TB = d.shape[0]

    # library size factor: one lane reduction for all modalities
    lib = jnp.sum(d, axis=-1)                                 # (TB, M)

    # padded conv rows per modality: [zeros(P) | log(data+1) | batch_id]
    logd = jnp.log(d + 1.0)                                   # single EUP pass over block
    bid = bid_ref[...]                                        # (TB, S)
    padz = jnp.zeros((TB, P), jnp.float32)

    # hoist the K shifted windows per modality (M*K slices, reused by all C channels)
    wins = []
    for m in range(M):
        row = jnp.concatenate([padz, logd[:, m, :], bid], axis=-1)   # (TB, Lp)
        wins.append([row[:, k:k + L_out] for k in range(K)])

    # Conv1d (stride 1) + folded BN + ReLU; each channel goes into a 128-lane-aligned
    # slab of the q scratch (flatten order matches the prep-time-padded fcEnc weight).
    if L_pad > L_out:
        chan_pad = jnp.zeros((TB, L_pad - L_out), jnp.float32)   # hoisted (no CSE in loop)
    for c in range(C):
        acc = jnp.zeros((TB, L_out), jnp.float32)
        for m in range(M):
            for k in range(K):
                acc = acc + wins[m][k] * wconv_ref[(c * M + m) * K + k]
        ch = jnp.maximum(acc + bconv_ref[c], 0.0)
        if L_pad > L_out:
            ch = jnp.concatenate([ch, chan_pad], axis=-1)
        q_sc[:, c * L_pad:(c + 1) * L_pad] = ch.astype(jnp.bfloat16)

    # fcEnc (BN folded): bf16 operands, f32 accumulation on the MXU
    h = jnp.dot(q_sc[...], wfc_ref[...],
                preferred_element_type=jnp.float32) + bfc_ref[...]
    h = jnp.maximum(h, 0.0)                                   # (TB, H)

    # fused latent heads: one (H, 2D) bf16 GEMM -> [mean | logvar]
    mv = jnp.dot(h.astype(jnp.bfloat16), wmv_ref[...],
                 preferred_element_type=jnp.float32) + bmv_ref[...]
    mean = mv[:, :D]
    std = jnp.exp(0.5 * mv[:, D:])                            # one EUP transcendental
    var = std * std
    z = mean + std * eps_ref[...]

    # single lane-dense store: [mean | var | z | lib | zero pad]
    pieces = [mean, var, z, lib]
    used = 3 * D + M
    if OUT_W > used:
        pieces.append(jnp.zeros((TB, OUT_W - used), jnp.float32))
    out_ref[...] = jnp.concatenate(pieces, axis=-1)


# --------------------------------------------------------------------------- wrapper
def _pick_tile_b(B, bytes_per_row, *, vmem_budget_bytes):
    """Largest multiple-of-16 batch tile that fits the VMEM budget (~4x the per-row
    working set for double-buffered blocks + scratch + live temps), capped at 256 rows
    and kept small enough that the grid has >=2 steps whenever B allows it, so the
    v7x megacore can shard the batch over both TensorCores."""
    fit = vmem_budget_bytes // max(1, 4 * bytes_per_row)
    t = max(16, min(256, (fit // 16) * 16))
    if B > 16:
        t = min(t, _round_up(pl.cdiv(B, 2), 16))
    return int(min(t, _round_up(B, 16)))


def encoder_forward(params, data, batch_id, eps, *, tile_b=None,
                    vmem_limit_bytes=48 * 1024 * 1024):
    B, M, F = data.shape
    S = batch_id.shape[1]
    C, K, P = params['C'], params['K'], params['P']
    L_out, L_pad, H, D = params['L_out'], params['L_pad'], params['H'], params['D']
    OUT_W = params['OUT_W']
    Lp = F + S + P

    if tile_b is None:
        bytes_per_row = (2 * 4 * (M * F + S + D + OUT_W)          # double-buffered blocks
                         + 2 * C * L_pad                          # bf16 q scratch
                         + 4 * (M * (K + 1) * Lp + L_out + H + 2 * D))  # live f32 temps
        tile_b = _pick_tile_b(B, bytes_per_row, vmem_budget_bytes=vmem_limit_bytes)

    # pad the batch to a whole number of tiles (log(0+1)=0 keeps pad rows benign)
    B_pad = _round_up(B, tile_b)
    if B_pad != B:
        pad = B_pad - B
        data = jnp.pad(data, ((0, pad), (0, 0), (0, 0)))
        batch_id = jnp.pad(batch_id, ((0, pad), (0, 0)))
        eps = jnp.pad(eps, ((0, pad), (0, 0)))
    grid = (B_pad // tile_b,)

    kernel = functools.partial(_encoder_kernel, M=M, K=K, C=C, P=P,
                               L_out=L_out, L_pad=L_pad, D=D, OUT_W=OUT_W)

    def resident(shape):                 # constant index_map -> fetched once, VMEM resident
        return pl.BlockSpec(shape, lambda i, _n=len(shape): (0,) * _n)

    def tiled(shape):                    # activations: tiled over the batch axis
        return pl.BlockSpec((tile_b,) + shape[1:],
                            lambda i, _n=len(shape): (i,) + (0,) * (_n - 1))

    smem = pl.BlockSpec(memory_space=pltpu.MemorySpace.SMEM)

    out = pl.pallas_call(
        kernel,
        out_shape=jax.ShapeDtypeStruct((B_pad, OUT_W), jnp.float32),
        grid=grid,
        in_specs=[tiled((B_pad, M, F)),                  # data
                  tiled((B_pad, S)),                     # batch_id
                  tiled((B_pad, D)),                     # eps
                  smem,                                  # folded conv weights (taps)
                  smem,                                  # folded conv bias
                  resident(params['wfc'].shape), resident(params['bfc'].shape),
                  resident(params['wmv'].shape), resident(params['bmv'].shape)],
        out_specs=pl.BlockSpec((tile_b, OUT_W), lambda i: (i, 0)),
        scratch_shapes=[pltpu.VMEM((tile_b, C * L_pad), jnp.bfloat16)],
        compiler_params=pltpu.CompilerParams(
            dimension_semantics=("parallel",),
            vmem_limit_bytes=vmem_limit_bytes),          # <= 64 MiB keeps v7x safe
    )(data, batch_id, eps,
      params['wconv_flat'], params['bconv_fold'],
      params['wfc'], params['bfc'], params['wmv'], params['bmv'])

    out = out[:B]
    mean = out[:, :D]
    var = out[:, D:2 * D]
    z = out[:, 2 * D:3 * D]
    lib = out[:, 3 * D:3 * D + M]
    return mean, var, z, lib


# --------------------------------------------------------------------------- module
class EncoderConvNetL1AltPallas:
    """JAX/Pallas re-implementation of EncoderConvNetL1Alt (eval mode)."""

    def __init__(self, num_feature, num_modality, num_sample, dim_latent=20,
                 num_hidden_units=128, num_channel=(4,), size_conv_kernel=3,
                 size_stride=1, dropout_rate=0.2, key=None):
        assert size_stride == 1      # TODO(synk): strided conv slicing not implemented
        assert num_sample > 1        # TODO(synk): batch_id width==1 (no-concat) branch not implemented
        F, M, S = num_feature, num_modality, num_sample
        K, C, H, D = size_conv_kernel, num_channel[0], num_hidden_units, dim_latent

        # same left-pad formula as the PyTorch module (stride 1): P = S + K - 1
        P = int(math.ceil((F + S) / size_stride) - 1) * size_stride - F + K
        Lp = F + S + P
        L_out = (Lp - K) // size_stride + 1
        L_pad = _round_up(L_out, 128)               # lane-aligned channel slab width
        fc_in = C * L_out
        OUT_W = _round_up(3 * D + M, 128)           # packed [mean|var|z|lib] width

        if key is None:
            key = jax.random.PRNGKey(0)
        ks = iter(jax.random.split(key, 24))

        def u(k, shape, fan_in):
            b = 1.0 / math.sqrt(fan_in)
            return jax.random.uniform(k, shape, jnp.float32, -b, b)

        # raw (PyTorch-layout) parameters — kept for the pure-JAX reference
        self.wconv = u(next(ks), (C, M, K), M * K)           # Conv1d weight (O, I, K)
        self.bconv = u(next(ks), (C,), M * K)
        self.g1 = 1.0 + 0.1 * jax.random.normal(next(ks), (C,), jnp.float32)
        self.b1 = 0.1 * jax.random.normal(next(ks), (C,), jnp.float32)
        self.rm1 = 0.1 * jax.random.normal(next(ks), (C,), jnp.float32)
        self.rv1 = 0.5 + jax.random.uniform(next(ks), (C,), jnp.float32)
        self.wfc = u(next(ks), (fc_in, H), fc_in)            # stored (in, out): x @ W
        self.bfc = u(next(ks), (H,), fc_in)
        self.g2 = 1.0 + 0.1 * jax.random.normal(next(ks), (H,), jnp.float32)
        self.b2 = 0.1 * jax.random.normal(next(ks), (H,), jnp.float32)
        self.rm2 = 0.1 * jax.random.normal(next(ks), (H,), jnp.float32)
        self.rv2 = 0.5 + jax.random.uniform(next(ks), (H,), jnp.float32)
        self.wm = u(next(ks), (H, D), H)
        self.bm = u(next(ks), (D,), H)
        self.wv = u(next(ks), (H, D), H)
        self.bv = u(next(ks), (D,), H)

        # fold eval-mode BatchNorm into the preceding linear maps
        eps = 1e-5
        s1 = self.g1 / jnp.sqrt(self.rv1 + eps)              # (C,)
        wconv_f = self.wconv * s1[:, None, None]
        bconv_f = (self.bconv - self.rm1) * s1 + self.b1
        s2 = self.g2 / jnp.sqrt(self.rv2 + eps)              # (H,)
        wfc_f = self.wfc * s2[None, :]
        bfc_f = (self.bfc - self.rm2) * s2 + self.b2

        # prep-time layout plumbing (perf feedback):
        #  * zero-pad the folded fc weight rows so each conv channel occupies a
        #    128-lane-aligned slab of the kernel's q scratch (channel-major flatten,
        #    identical to PyTorch's q.view(B, -1); padded rows are zero so extra
        #    lanes contribute nothing).
        #  * fuse the mean / logvar heads into one (H, 2D) matrix.
        wfc_pad = jnp.pad(wfc_f.reshape(C, L_out, H),
                          ((0, 0), (0, L_pad - L_out), (0, 0))).reshape(C * L_pad, H)
        wmv = jnp.concatenate([self.wm, self.wv], axis=1)    # (H, 2D)
        bmv = jnp.concatenate([self.bm, self.bv], axis=0)    # (2D,)

        self.params = dict(
            C=C, K=K, P=P, L_out=L_out, L_pad=L_pad, H=H, D=D, M=M, F=F, S=S,
            OUT_W=OUT_W,
            wconv_flat=wconv_f.reshape(-1),                  # (C*M*K,) -> SMEM scalars
            bconv_fold=bconv_f,                              # (C,)     -> SMEM scalars
            wfc=wfc_pad.astype(jnp.bfloat16),                # bf16 MXU operand (padded)
            bfc=bfc_f.reshape(1, H).astype(jnp.float32),
            wmv=wmv.astype(jnp.bfloat16),                    # bf16 fused latent heads
            bmv=bmv.reshape(1, 2 * D).astype(jnp.float32))

    def __call__(self, data, batch_id, eps, *, tile_b=None,
                 vmem_limit_bytes=48 * 1024 * 1024):
        B, M, F = data.shape
        mean, var, z, lib = encoder_forward(self.params, data, batch_id, eps,
                                            tile_b=tile_b,
                                            vmem_limit_bytes=vmem_limit_bytes)
        lib_full = jnp.broadcast_to(lib[:, :, None], (B, M, F))   # repeat over features
        return mean, var, z, lib_full


# --------------------------------------------------------------------------- reference
def _ref_forward(enc, data, batch_id, eps):
    """Pure-JAX f32 reference with UNFOLDED BatchNorm (mirrors the PyTorch module)."""
    B, M, F = data.shape
    lib = jnp.repeat(jnp.sum(data, axis=2, keepdims=True), F, axis=2)
    x = jnp.log(data + 1.0)
    bidM = jnp.repeat(batch_id[:, None, :], M, axis=1)
    xp = jnp.pad(jnp.concatenate([x, bidM], axis=-1),
                 ((0, 0), (0, 0), (enc.params['P'], 0)))
    y = jax.lax.conv_general_dilated(xp, enc.wconv, (1,), 'VALID',
                                     dimension_numbers=('NCH', 'OIH', 'NCH'))
    y = y + enc.bconv[None, :, None]
    y = ((y - enc.rm1[None, :, None]) / jnp.sqrt(enc.rv1[None, :, None] + 1e-5)
         * enc.g1[None, :, None] + enc.b1[None, :, None])
    y = jnp.maximum(y, 0.0)
    q = y.reshape(B, -1)
    h = q @ enc.wfc + enc.bfc
    h = (h - enc.rm2) / jnp.sqrt(enc.rv2 + 1e-5) * enc.g2 + enc.b2
    h = jnp.maximum(h, 0.0)
    mean = h @ enc.wm + enc.bm
    var = jnp.exp(h @ enc.wv + enc.bv)
    z = mean + jnp.sqrt(var) * eps
    return mean, var, z, lib


# --------------------------------------------------------------------------- main
if __name__ == "__main__":
    B, M, F, S, D, H, C, K = 64, 2, 16, 4, 20, 32, 4, 3

    key = jax.random.PRNGKey(0)
    k_data, k_bid, k_eps, k_par = jax.random.split(key, 4)

    data = jax.random.uniform(k_data, (B, M, F), jnp.float32, 0.0, 3.0)   # count-like
    batch_id = jax.nn.one_hot(jax.random.randint(k_bid, (B,), 0, S), S,
                              dtype=jnp.float32)
    eps = jax.random.normal(k_eps, (B, D), jnp.float32)                   # rsample noise

    enc = EncoderConvNetL1AltPallas(num_feature=F, num_modality=M, num_sample=S,
                                    dim_latent=D, num_hidden_units=H,
                                    num_channel=(C,), size_conv_kernel=K,
                                    key=k_par)

    mean, var, z, lib = enc(data, batch_id, eps)
    mean, var, z, lib = jax.block_until_ready((mean, var, z, lib))

    # reference uses unfolded BN + f32 weights; kernel uses folded BN + bf16 MXU
    # operands, hence the looser tolerance on the bf16-touched outputs.
    mean_r, var_r, z_r, lib_r = _ref_forward(enc, data, batch_id, eps)
    assert mean.shape == (B, D) and var.shape == (B, D) and z.shape == (B, D)
    assert lib.shape == (B, M, F)
    assert jnp.allclose(lib, lib_r, rtol=1e-5, atol=1e-5)
    assert jnp.allclose(mean, mean_r, rtol=5e-2, atol=5e-2)
    assert jnp.allclose(var, var_r, rtol=5e-2, atol=5e-2)
    assert jnp.allclose(z, z_r, rtol=5e-2, atol=5e-2)

    print("KERNEL_OK")
</pallas_src>

<mosaic_0001>
module attributes {stable_mosaic.version = 11 : i64} {
  func.func @_encoder_kernel(%arg0: i32, %arg1: memref<32x2x16xf32, #tpu.memory_space<vmem>>, %arg2: memref<32x4xf32, #tpu.memory_space<vmem>>, %arg3: memref<32x20xf32, #tpu.memory_space<vmem>>, %arg4: memref<24xf32, #tpu.memory_space<smem>>, %arg5: memref<4xf32, #tpu.memory_space<smem>>, %arg6: memref<512x32xbf16, #tpu.memory_space<vmem>>, %arg7: memref<1x32xf32, #tpu.memory_space<vmem>>, %arg8: memref<32x40xbf16, #tpu.memory_space<vmem>>, %arg9: memref<1x40xf32, #tpu.memory_space<vmem>>, %arg10: memref<32x128xf32, #tpu.memory_space<vmem>>, %arg11: memref<32x512xbf16, #tpu.memory_space<vmem>>) attributes {dimension_semantics = [#tpu.dimension_semantics<parallel>], iteration_bounds = array<i64: 2>, scalar_prefetch = 0 : i64, scratch_operands = 1 : i64, tpu.core_type = #tpu.core_type<tc>, window_params = [{transform_indices = @transform_0, window_bounds = array<i64: 32, 2, 16>}, {transform_indices = @transform_1, window_bounds = array<i64: 32, 4>}, {transform_indices = @transform_2, window_bounds = array<i64: 32, 20>}, {transform_indices = @transform_3, window_bounds = array<i64: 24>}, {transform_indices = @transform_4, window_bounds = array<i64: 4>}, {pipeline_mode = #tpu.pipeline_mode<synchronous>, transform_indices = @transform_5, window_bounds = array<i64: 512, 32>}, {pipeline_mode = #tpu.pipeline_mode<synchronous>, transform_indices = @transform_6, window_bounds = array<i64: 1, 32>}, {pipeline_mode = #tpu.pipeline_mode<synchronous>, transform_indices = @transform_7, window_bounds = array<i64: 32, 40>}, {pipeline_mode = #tpu.pipeline_mode<synchronous>, transform_indices = @transform_8, window_bounds = array<i64: 1, 40>}, {transform_indices = @transform_9, window_bounds = array<i64: 32, 128>}]} {
    %c0 = arith.constant 0 : index
    %c0_0 = arith.constant 0 : index
    %c0_1 = arith.constant 0 : index
    %0 = vector.load %arg1[%c0, %c0_0, %c0_1] : memref<32x2x16xf32, #tpu.memory_space<vmem>>, vector<32x2x16xf32>
    %cst = arith.constant dense<0.000000e+00> : vector<32x2xf32>
    %1 = vector.multi_reduction <add>, %0, %cst [2] : vector<32x2x16xf32> to vector<32x2xf32>
    %cst_2 = arith.constant 1.000000e+00 : f32
    %2 = vector.broadcast %cst_2 : f32 to vector<32x2x16xf32>
    %3 = arith.addf %0, %2 : vector<32x2x16xf32>
    %4 = math.log %3 : vector<32x2x16xf32>
    %c0_3 = arith.constant 0 : index
    %c0_4 = arith.constant 0 : index
    %5 = vector.load %arg2[%c0_3, %c0_4] : memref<32x4xf32, #tpu.memory_space<vmem>>, vector<32x4xf32>
    %cst_5 = arith.constant 0.000000e+00 : f32
    %6 = vector.broadcast %cst_5 : f32 to vector<32x6xf32>
    %7 = vector.extract_strided_slice %4 {offsets = [0, 0, 0], sizes = [32, 1, 16], strides = [1, 1, 1]} : vector<32x2x16xf32> to vector<32x1x16xf32>
    %8 = vector.shape_cast %7 : vector<32x1x16xf32> to vector<32x16xf32>
    %9 = tpu.concatenate %6, %8, %5 in 1 : vector<32x6xf32>, vector<32x16xf32>, vector<32x4xf32> -> vector<32x26xf32>
    %10 = vector.extract_strided_slice %9 {offsets = [0, 0], sizes = [32, 24], strides = [1, 1]} : vector<32x26xf32> to vector<32x24xf32>
    %11 = vector.extract_strided_slice %9 {offsets = [0, 1], sizes = [32, 24], strides = [1, 1]} : vector<32x26xf32> to vector<32x24xf32>
    %12 = vector.extract_strided_slice %9 {offsets = [0, 2], sizes = [32, 24], strides = [1, 1]} : vector<32x26xf32> to vector<32x24xf32>
    %13 = vector.extract_strided_slice %4 {offsets = [0, 1, 0], sizes = [32, 1, 16], strides = [1, 1, 1]} : vector<32x2x16xf32> to vector<32x1x16xf32>
    %14 = vector.shape_cast %13 : vector<32x1x16xf32> to vector<32x16xf32>
    %15 = tpu.concatenate %6, %14, %5 in 1 : vector<32x6xf32>, vector<32x16xf32>, vector<32x4xf32> -> vector<32x26xf32>
    %16 = vector.extract_strided_slice %15 {offsets = [0, 0], sizes = [32, 24], strides = [1, 1]} : vector<32x26xf32> to vector<32x24xf32>
    %17 = vector.extract_strided_slice %15 {offsets = [0, 1], sizes = [32, 24], strides = [1, 1]} : vector<32x26xf32> to vector<32x24xf32>
    %18 = vector.extract_strided_slice %15 {offsets = [0, 2], sizes = [32, 24], strides = [1, 1]} : vector<32x26xf32> to vector<32x24xf32>
    %cst_6 = arith.constant 0.000000e+00 : f32
    %19 = vector.broadcast %cst_6 : f32 to vector<32x104xf32>
    %cst_7 = arith.constant 0.000000e+00 : f32
    %20 = vector.broadcast %cst_7 : f32 to vector<32x24xf32>
    %c0_8 = arith.constant 0 : index
    %21 = memref.load %arg4[%c0_8] : memref<24xf32, #tpu.memory_space<smem>>
    %22 = vector.broadcast %21 : f32 to vector<32x24xf32>
    %23 = arith.mulf %10, %22 : vector<32x24xf32>
    %24 = arith.addf %20, %23 : vector<32x24xf32>
    %c1 = arith.constant 1 : index
    %25 = memref.load %arg4[%c1] : memref<24xf32, #tpu.memory_space<smem>>
    %26 = vector.broadcast %25 : f32 to vector<32x24xf32>
    %27 = arith.mulf %11, %26 : vector<32x24xf32>
    %28 = arith.addf %24, %27 : vector<32x24xf32>
    %c2 = arith.constant 2 : index
    %29 = memref.load %arg4[%c2] : memref<24xf32, #tpu.memory_space<smem>>
    %30 = vector.broadcast %29 : f32 to vector<32x24xf32>
    %31 = arith.mulf %12, %30 : vector<32x24xf32>
    %32 = arith.addf %28, %31 : vector<32x24xf32>
    %c3 = arith.constant 3 : index
    %33 = memref.load %arg4[%c3] : memref<24xf32, #tpu.memory_space<smem>>
    %34 = vector.broadcast %33 : f32 to vector<32x24xf32>
    %35 = arith.mulf %16, %34 : vector<32x24xf32>
    %36 = arith.addf %32, %35 : vector<32x24xf32>
    %c4 = arith.constant 4 : index
    %37 = memref.load %arg4[%c4] : memref<24xf32, #tpu.memory_space<smem>>
    %38 = vector.broadcast %37 : f32 to vector<32x24xf32>
    %39 = arith.mulf %17, %38 : vector<32x24xf32>
    %40 = arith.addf %36, %39 : vector<32x24xf32>
    %c5 = arith.constant 5 : index
    %41 = memref.load %arg4[%c5] : memref<24xf32, #tpu.memory_space<smem>>
    %42 = vector.broadcast %41 : f32 to vector<32x24xf32>
    %43 = arith.mulf %18, %42 : vector<32x24xf32>
    %44 = arith.addf %40, %43 : vector<32x24xf32>
    %c0_9 = arith.constant 0 : index
    %45 = memref.load %arg5[%c0_9] : memref<4xf32, #tpu.memory_space<smem>>
    %46 = vector.broadcast %45 : f32 to vector<32x24xf32>
    %47 = arith.addf %44, %46 : vector<32x24xf32>
    %cst_10 = arith.constant 0.000000e+00 : f32
    %48 = vector.broadcast %cst_10 : f32 to vector<32x24xf32>
    %49 = arith.maximumf %47, %48 : vector<32x24xf32>
    %50 = tpu.concatenate %49, %19 in 1 : vector<32x24xf32>, vector<32x104xf32> -> vector<32x128xf32>
    %51 = arith.truncf %50 : vector<32x128xf32> to vector<32x128xbf16>
    %c0_11 = arith.constant 0 : index
    %c0_12 = arith.constant 0 : index
    %52 = vector.load %arg11[%c0_11, %c0_12] : memref<32x512xbf16, #tpu.memory_space<vmem>>, vector<32x128xbf16>
    tpu.vector_store %arg11[%c0_11, %c0_12], %51 {strides = array<i32>} : memref<32x512xbf16, #tpu.memory_space<vmem>>, vector<32x128xbf16>,
    %cst_13 = arith.constant 0.000000e+00 : f32
    %53 = vector.broadcast %cst_13 : f32 to vector<32x24xf32>
    %c6 = arith.constant 6 : index
    %54 = memref.load %arg4[%c6] : memref<24xf32, #tpu.memory_space<smem>>
    %55 = vector.broadcast %54 : f32 to vector<32x24xf32>
    %56 = arith.mulf %10, %55 : vector<32x24xf32>
    %57 = arith.addf %53, %56 : vector<32x24xf32>
    %c7 = arith.constant 7 : index
    %58 = memref.load %arg4[%c7] : memref<24xf32, #tpu.memory_space<smem>>
    %59 = vector.broadcast %58 : f32 to vector<32x24xf32>
    %60 = arith.mulf %11, %59 : vector<32x24xf32>
    %61 = arith.addf %57, %60 : vector<32x24xf32>
    %c8 = arith.constant 8 : index
    %62 = memref.load %arg4[%c8] : memref<24xf32, #tpu.memory_space<smem>>
    %63 = vector.broadcast %62 : f32 to vector<32x24xf32>
    %64 = arith.mulf %12, %63 : vector<32x24xf32>
    %65 = arith.addf %61, %64 : vector<32x24xf32>
    %c9 = arith.constant 9 : index
    %66 = memref.load %arg4[%c9] : memref<24xf32, #tpu.memory_space<smem>>
    %67 = vector.broadcast %66 : f32 to vector<32x24xf32>
    %68 = arith.mulf %16, %67 : vector<32x24xf32>
    %69 = arith.addf %65, %68 : vector<32x24xf32>
    %c10 = arith.constant 10 : index
    %70 = memref.load %arg4[%c10] : memref<24xf32, #tpu.memory_space<smem>>
    %71 = vector.broadcast %70 : f32 to vector<32x24xf32>
    %72 = arith.mulf %17, %71 : vector<32x24xf32>
    %73 = arith.addf %69, %72 : vector<32x24xf32>
    %c11 = arith.constant 11 : index
    %74 = memref.load %arg4[%c11] : memref<24xf32, #tpu.memory_space<smem>>
    %75 = vector.broadcast %74 : f32 to vector<32x24xf32>
    %76 = arith.mulf %18, %75 : vector<32x24xf32>
    %77 = arith.addf %73, %76 : vector<32x24xf32>
    %c1_14 = arith.constant 1 : index
    %78 = memref.load %arg5[%c1_14] : memref<4xf32, #tpu.memory_space<smem>>
    %79 = vector.broadcast %78 : f32 to vector<32x24xf32>
    %80 = arith.addf %77, %79 : vector<32x24xf32>
    %cst_15 = arith.constant 0.000000e+00 : f32
    %81 = vector.broadcast %cst_15 : f32 to vector<32x24xf32>
    %82 = arith.maximumf %80, %81 : vector<32x24xf32>
    %83 = tpu.concatenate %82, %19 in 1 : vector<32x24xf32>, vector<32x104xf32> -> vector<32x128xf32>
    %84 = arith.truncf %83 : vector<32x128xf32> to vector<32x128xbf16>
    %c0_16 = arith.constant 0 : index
    %c128 = arith.constant 128 : index
    %85 = vector.load %arg11[%c0_16, %c128] : memref<32x512xbf16, #tpu.memory_space<vmem>>, vector<32x128xbf16>
    tpu.vector_store %arg11[%c0_16, %c128], %84 {strides = array<i32>} : memref<32x512xbf16, #tpu.memory_space<vmem>>, vector<32x128xbf16>,
    %cst_17 = arith.constant 0.000000e+00 : f32
    %86 = vector.broadcast %cst_17 : f32 to vector<32x24xf32>
    %c12 = arith.constant 12 : index
    %87 = memref.load %arg4[%c12] : memref<24xf32, #tpu.memory_space<smem>>
    %88 = vector.broadcast %87 : f32 to vector<32x24xf32>
    %89 = arith.mulf %10, %88 : vector<32x24xf32>
    %90 = arith.addf %86, %89 : vector<32x24xf32>
    %c13 = arith.constant 13 : index
    %91 = memref.load %arg4[%c13] : memref<24xf32, #tpu.memory_space<smem>>
    %92 = vector.broadcast %91 : f32 to vector<32x24xf32>
    %93 = arith.mulf %11, %92 : vector<32x24xf32>
    %94 = arith.addf %90, %93 : vector<32x24xf32>
    %c14 = arith.constant 14 : index
    %95 = memref.load %arg4[%c14] : memref<24xf32, #tpu.memory_space<smem>>
    %96 = vector.broadcast %95 : f32 to vector<32x24xf32>
    %97 = arith.mulf %12, %96 : vector<32x24xf32>
    %98 = arith.addf %94, %97 : vector<32x24xf32>
    %c15 = arith.constant 15 : index
    %99 = memref.load %arg4[%c15] : memref<24xf32, #tpu.memory_space<smem>>
    %100 = vector.broadcast %99 : f32 to vector<32x24xf32>
    %101 = arith.mulf %16, %100 : vector<32x24xf32>
    %102 = arith.addf %98, %101 : vector<32x24xf32>
    %c16 = arith.constant 16 : index
    %103 = memref.load %arg4[%c16] : memref<24xf32, #tpu.memory_space<smem>>
    %104 = vector.broadcast %103 : f32 to vector<32x24xf32>
    %105 = arith.mulf %17, %104 : vector<32x24xf32>
    %106 = arith.addf %102, %105 : vector<32x24xf32>
    %c17 = arith.constant 17 : index
    %107 = memref.load %arg4[%c17] : memref<24xf32, #tpu.memory_space<smem>>
    %108 = vector.broadcast %107 : f32 to vector<32x24xf32>
    %109 = arith.mulf %18, %108 : vector<32x24xf32>
    %110 = arith.addf %106, %109 : vector<32x24xf32>
    %c2_18 = arith.constant 2 : index
    %111 = memref.load %arg5[%c2_18] : memref<4xf32, #tpu.memory_space<smem>>
    %112 = vector.broadcast %111 : f32 to vector<32x24xf32>
    %113 = arith.addf %110, %112 : vector<32x24xf32>
    %cst_19 = arith.constant 0.000000e+00 : f32
    %114 = vector.broadcast %cst_19 : f32 to vector<32x24xf32>
    %115 = arith.maximumf %113, %114 : vector<32x24xf32>
    %116 = tpu.concatenate %115, %19 in 1 : vector<32x24xf32>, vector<32x104xf32> -> vector<32x128xf32>
    %117 = arith.truncf %116 : vector<32x128xf32> to vector<32x128xbf16>
    %c0_20 = arith.constant 0 : index
    %c256 = arith.constant 256 : index
    %118 = vector.load %arg11[%c0_20, %c256] : memref<32x512xbf16, #tpu.memory_space<vmem>>, vector<32x128xbf16>
    tpu.vector_store %arg11[%c0_20, %c256], %117 {strides = array<i32>} : memref<32x512xbf16, #tpu.memory_space<vmem>>, vector<32x128xbf16>,
    %cst_21 = arith.constant 0.000000e+00 : f32
    %119 = vector.broadcast %cst_21 : f32 to vector<32x24xf32>
    %c18 = arith.constant 18 : index
    %120 = memref.load %arg4[%c18] : memref<24xf32, #tpu.memory_space<smem>>
    %121 = vector.broadcast %120 : f32 to vector<32x24xf32>
    %122 = arith.mulf %10, %121 : vector<32x24xf32>
    %123 = arith.addf %119, %122 : vector<32x24xf32>
    %c19 = arith.constant 19 : index
    %124 = memref.load %arg4[%c19] : memref<24xf32, #tpu.memory_space<smem>>
    %125 = vector.broadcast %124 : f32 to vector<32x24xf32>
    %126 = arith.mulf %11, %125 : vector<32x24xf32>
    %127 = arith.addf %123, %126 : vector<32x24xf32>
    %c20 = arith.constant 20 : index
    %128 = memref.load %arg4[%c20] : memref<24xf32, #tpu.memory_space<smem>>
    %129 = vector.broadcast %128 : f32 to vector<32x24xf32>
    %130 = arith.mulf %12, %129 : vector<32x24xf32>
    %131 = arith.addf %127, %130 : vector<32x24xf32>
    %c21 = arith.constant 21 : index
    %132 = memref.load %arg4[%c21] : memref<24xf32, #tpu.memory_space<smem>>
    %133 = vector.broadcast %132 : f32 to vector<32x24xf32>
    %134 = arith.mulf %16, %133 : vector<32x24xf32>
    %135 = arith.addf %131, %134 : vector<32x24xf32>
    %c22 = arith.constant 22 : index
    %136 = memref.load %arg4[%c22] : memref<24xf32, #tpu.memory_space<smem>>
    %137 = vector.broadcast %136 : f32 to vector<32x24xf32>
    %138 = arith.mulf %17, %137 : vector<32x24xf32>
    %139 = arith.addf %135, %138 : vector<32x24xf32>
    %c23 = arith.constant 23 : index
    %140 = memref.load %arg4[%c23] : memref<24xf32, #tpu.memory_space<smem>>
    %141 = vector.broadcast %140 : f32 to vector<32x24xf32>
    %142 = arith.mulf %18, %141 : vector<32x24xf32>
    %143 = arith.addf %139, %142 : vector<32x24xf32>
    %c3_22 = arith.constant 3 : index
    %144 = memref.load %arg5[%c3_22] : memref<4xf32, #tpu.memory_space<smem>>
    %145 = vector.broadcast %144 : f32 to vector<32x24xf32>
    %146 = arith.addf %143, %145 : vector<32x24xf32>
    %cst_23 = arith.constant 0.000000e+00 : f32
    %147 = vector.broadcast %cst_23 : f32 to vector<32x24xf32>
    %148 = arith.maximumf %146, %147 : vector<32x24xf32>
    %149 = tpu.concatenate %148, %19 in 1 : vector<32x24xf32>, vector<32x104xf32> -> vector<32x128xf32>
    %150 = arith.truncf %149 : vector<32x128xf32> to vector<32x128xbf16>
    %c0_24 = arith.constant 0 : index
    %c384 = arith.constant 384 : index
    %151 = vector.load %arg11[%c0_24, %c384] : memref<32x512xbf16, #tpu.memory_space<vmem>>, vector<32x128xbf16>
    tpu.vector_store %arg11[%c0_24, %c384], %150 {strides = array<i32>} : memref<32x512xbf16, #tpu.memory_space<vmem>>, vector<32x128xbf16>,
    %c0_25 = arith.constant 0 : index
    %c0_26 = arith.constant 0 : index
    %152 = vector.load %arg11[%c0_25, %c0_26] : memref<32x512xbf16, #tpu.memory_space<vmem>>, vector<32x512xbf16>
    %c0_27 = arith.constant 0 : index
    %c0_28 = arith.constant 0 : index
    %153 = vector.load %arg6[%c0_27, %c0_28] : memref<512x32xbf16, #tpu.memory_space<vmem>>, vector<512x32xbf16>
    %cst_29 = arith.constant dense<0.000000e+00> : vector<32x32xf32>
    %154 = tpu.matmul %152, %153, %cst_29 {dimension_numbers = #tpu.dot_dimension_numbers<[1], [0], [0], [1], [0, 0, 1, 1], [], []>} : vector<32x512xbf16>, vector<512x32xbf16>, vector<32x32xf32> -> vector<32x32xf32>
    %c0_30 = arith.constant 0 : index
    %c0_31 = arith.constant 0 : index
    %155 = vector.load %arg7[%c0_30, %c0_31] : memref<1x32xf32, #tpu.memory_space<vmem>>, vector<1x32xf32>
    %156 = vector.broadcast %155 : vector<1x32xf32> to vector<32x32xf32>
    %157 = arith.addf %154, %156 : vector<32x32xf32>
    %cst_32 = arith.constant 0.000000e+00 : f32
    %158 = vector.broadcast %cst_32 : f32 to vector<32x32xf32>
    %159 = arith.maximumf %157, %158 : vector<32x32xf32>
    %160 = arith.truncf %159 : vector<32x32xf32> to vector<32x32xbf16>
    %c0_33 = arith.constant 0 : index
    %c0_34 = arith.constant 0 : index
    %161 = vector.load %arg8[%c0_33, %c0_34] : memref<32x40xbf16, #tpu.memory_space<vmem>>, vector<32x40xbf16>
    %cst_35 = arith.constant dense<0.000000e+00> : vector<32x40xf32>
    %162 = tpu.matmul %160, %161, %cst_35 {dimension_numbers = #tpu.dot_dimension_numbers<[1], [0], [0], [1], [0, 0, 1, 1], [], []>} : vector<32x32xbf16>, vector<32x40xbf16>, vector<32x40xf32> -> vector<32x40xf32>
    %c0_36 = arith.constant 0 : index
    %c0_37 = arith.constant 0 : index
    %163 = vector.load %arg9[%c0_36, %c0_37] : memref<1x40xf32, #tpu.memory_space<vmem>>, vector<1x40xf32>
    %164 = vector.broadcast %163 : vector<1x40xf32> to vector<32x40xf32>
    %165 = arith.addf %162, %164 : vector<32x40xf32>
    %166 = vector.extract_strided_slice %165 {offsets = [0, 0], sizes = [32, 20], strides = [1, 1]} : vector<32x40xf32> to vector<32x20xf32>
    %167 = vector.extract_strided_slice %165 {offsets = [0, 20], sizes = [32, 20], strides = [1, 1]} : vector<32x40xf32> to vector<32x20xf32>
    %cst_38 = arith.constant 5.000000e-01 : f32
    %168 = vector.broadcast %cst_38 : f32 to vector<32x20xf32>
    %169 = arith.mulf %168, %167 : vector<32x20xf32>
    %170 = math.exp %169 : vector<32x20xf32>
    %171 = arith.mulf %170, %170 : vector<32x20xf32>
    %c0_39 = arith.constant 0 : index
    %c0_40 = arith.constant 0 : index
    %172 = vector.load %arg3[%c0_39, %c0_40] : memref<32x20xf32, #tpu.memory_space<vmem>>, vector<32x20xf32>
    %173 = arith.mulf %170, %172 : vector<32x20xf32>
    %174 = arith.addf %166, %173 : vector<32x20xf32>
    %cst_41 = arith.constant 0.000000e+00 : f32
    %175 = vector.broadcast %cst_41 : f32 to vector<32x66xf32>
    %176 = tpu.concatenate %166, %171, %174, %1, %175 in 1 : vector<32x20xf32>, vector<32x20xf32>, vector<32x20xf32>, vector<32x2xf32>, vector<32x66xf32> -> vector<32x128xf32>
    %c0_42 = arith.constant 0 : index
    %c0_43 = arith.constant 0 : index
    %177 = vector.load %arg10[%c0_42, %c0_43] : memref<32x128xf32, #tpu.memory_space<vmem>>, vector<32x128xf32>
    tpu.vector_store %arg10[%c0_42, %c0_43], %176 {strides = array<i32>} : memref<32x128xf32, #tpu.memory_space<vmem>>, vector<32x128xf32>,
    return
  }
  func.func @transform_0(%arg0: i32) -> (i32, i32, i32) {
    %c0_i32 = arith.constant 0 : i32
    %c0_i32_0 = arith.constant 0 : i32
    %c0_i32_1 = arith.constant 0 : i32
    return %arg0, %c0_i32, %c0_i32_0 : i32, i32, i32
  }
  func.func @transform_1(%arg0: i32) -> (i32, i32) {
    %c0_i32 = arith.constant 0 : i32
    %c0_i32_0 = arith.constant 0 : i32
    return %arg0, %c0_i32 : i32, i32
  }
  func.func @transform_2(%arg0: i32) -> (i32, i32) {
    %c0_i32 = arith.constant 0 : i32
    %c0_i32_0 = arith.constant 0 : i32
    return %arg0, %c0_i32 : i32, i32
  }
  func.func @transform_3(%arg0: i32) -> i32 {
    %c0_i32 = arith.constant 0 : i32
    %c0_i32_0 = arith.constant 0 : i32
    return %c0_i32 : i32
  }
  func.func @transform_4(%arg0: i32) -> i32 {
    %c0_i32 = arith.constant 0 : i32
    %c0_i32_0 = arith.constant 0 : i32
    return %c0_i32 : i32
  }
  func.func @transform_5(%arg0: i32) -> (i32, i32) {
    %c0_i32 = arith.constant 0 : i32
    %c0_i32_0 = arith.constant 0 : i32
    %c0_i32_1 = arith.constant 0 : i32
    return %c0_i32, %c0_i32_0 : i32, i32
  }
  func.func @transform_6(%arg0: i32) -> (i32, i32) {
    %c0_i32 = arith.constant 0 : i32
    %c0_i32_0 = arith.constant 0 : i32
    %c0_i32_1 = arith.constant 0 : i32
    return %c0_i32, %c0_i32_0 : i32, i32
  }
  func.func @transform_7(%arg0: i32) -> (i32, i32) {
    %c0_i32 = arith.constant 0 : i32
    %c0_i32_0 = arith.constant 0 : i32
    %c0_i32_1 = arith.constant 0 : i32
    return %c0_i32, %c0_i32_0 : i32, i32
  }
  func.func @transform_8(%arg0: i32) -> (i32, i32) {
    %c0_i32 = arith.constant 0 : i32
    %c0_i32_0 = arith.constant 0 : i32
    %c0_i32_1 = arith.constant 0 : i32
    return %c0_i32, %c0_i32_0 : i32, i32
  }
  func.func @transform_9(%arg0: i32) -> (i32, i32) {
    %c0_i32 = arith.constant 0 : i32
    %c0_i32_0 = arith.constant 0 : i32
    return %arg0, %c0_i32 : i32, i32
  }
}

</mosaic_0001>

<bundles_post_ra>
// kernel: tpu_custom_call.1
= control target key start
LH: loop header
LB: loop body
LE: loop exit
PB: predicated region body
PF: predicated region fallthrough
CT: control target
= control target key end

     0   :  { %s3844_s0 = inlined_call_operand.vmem [shape: f32[64,2,16], index: 0, kind: input, shape index: {}]   ;;  %s3845_s1 = inlined_call_operand.vmem [shape: f32[64,4], index: 1, kind: input, shape index: {}]   ;;  %s3846_s2 = inlined_call_operand.vmem [shape: f32[64,20], index: 2, kind: input, shape index: {}]   ;;  %s3847_s3 = inlined_call_operand.vmem [shape: f32[24], index: 3, kind: input, shape index: {}]   ;;  %s3848_s4 = inlined_call_operand.vmem [shape: f32[4], index: 4, kind: input, shape index: {}]   ;;  %s3849_s5 = inlined_call_operand.vmem [shape: bf16[512,32], index: 5, kind: input, shape index: {}]   ;;  %s3850_s6 = inlined_call_operand.vmem [shape: f32[1,32], index: 6, kind: input, shape index: {}]   ;;  %s3851_s7 = inlined_call_operand.vmem [shape: bf16[32,40], index: 7, kind: input, shape index: {}]   ;;  %s3852_s8 = inlined_call_operand.vmem [shape: f32[1,40], index: 8, kind: input, shape index: {}]   ;;  %s3853_s9 = inlined_call_operand.hbm [shape: f32[64,128], index: 9, kind: output, shape index: {}]  }
   0x1   :  { %3860 = sst [smem:[#allocation12_spill]] %s3844_s0 }
   0x2   :  { %14 = vsyncpa [#allocation5], 0 }
   0x3   :  { %15 = vsyncpa [#allocation7], 0 }
   0x4   :  { %16 = vsyncpa [#allocation4], 0 }
   0x5   :  { %18 = vsyncpa [#allocation4 + $0x1], 0  ;;  %s2832_s30 = smov 0   ;;  %s2834_s10 = smov 0  }
   0x6   :  { %s2836_s11 = smov 0   ;;  %s2838_s12 = smov 0  }
   0x7 LB: > { %s2853_s13 = sadd.s32 4294967295, %s2768_s12   ;;  %s2284_s14 = sadd.s32 4294967294, %s2768_s12   ;;  %s2768_s12 = sphi %s2838_s12, %s3880_s12   ;;  %s2764_s11 = sphi %s2836_s11, %s3879_s11   ;;  %s2760_s10 = sphi %s2834_s10, %s3878_s10   ;;  %s2756_s30 = sphi %s2832_s30, %s3877_s30  }
   0x8   : > { %s2857_s15 = sadd.s32 1, %s2768_s12   ;;  %s235_s16 = sadd.s32 1, %s2764_s11 }
   0x9   : > { %s232_s17 = ssub.s32 %s2768_s12, %s2857_s15  ;;  %p245_p0 = scmp.ne.s32.totalorder %s2764_s11, %s2760_s10 }
   0xa   : > { %p233_p1 = scmp.eq.s32.totalorder %s232_s17, 0  ;;  %p246_p2 = scmp.eq.s32.totalorder %s2853_s13, 1 }
   0xb   : > { %p251_p3 = scmp.ne.s32.totalorder %s2760_s10, %s2756_s30  ;;  %p252_p4 = scmp.eq.s32.totalorder %s2284_s14, 1 }
   0xc   : > { %s2868_s18 = scalar_select %p233_p1, %s2764_s11, %s235_s16  }
   0xd   : > { %p2870_p5 = por %p246_p2, %p245_p0  ;;  %p2874_p6 = por %p252_p4, %p251_p3 }
   0xe   : > { %p2285_p7 = scmp.ge.s32.totalorder %s2768_s12, 1  ;;  %p259_p8 = scmp.lt.s32.totalorder %s2768_s12, 3 }
   0xf   : > { %s3861_s19 = scalar_select %p2870_p5, 1, 0 }
  0x10   : > { %s3862_s20 = scalar_select %p2874_p6, 1, 0 }
  0x11   : > { %p3854_p9 = scmp.eq.s32.totalorder %s2853_s13, 0  ;;  %p2881_p10 = pnand %p2285_p7, %p259_p8 }
  0x12   : > { %s272_s24 = sshll.u32 %s3847_s3, 4  ;;  %s283_s27 = sshll.u32 %s3848_s4, 4  ;;  %s273_s24 = int_to_ptr.vmem [resolvable:$true] %s272_s24  ;;  %s284_s27 = int_to_ptr.vmem [resolvable:$true] %s283_s27 }
  0x13   : > { %s3863_s21 = scalar_select %p2881_p10, 1, 0 }
  0x14   : > { %p2471_p11 = pneg %p2881_p10  ;;  %s2668_s29 = scalar_lea.vmem %s273_s24, 16 }
  0x15   : > { %p2669_p13 = scmp.ne.s32.totalorder %s273_s24, %s2668_s29  ;;  %p2676_p3 = scmp.lt.s32.totalorder %s273_s24, %s273_s24 }
  0x16   : > { %p2895_p12 = pnand %p3854_p9, %p2471_p11  ;;  %p2677_p4 = scmp.lt.s32.totalorder %s2668_s29, %s2668_s29 }
  0x18   : > { %p2670_p0 = pneg %p2895_p12  ;;  %p2678_p7 = por %p2677_p4, %p2676_p3 }
  0x1a   : > { %p2671_p1 = pnand %p2670_p0, %p2669_p13 }
  0x1c   : > { %p2672_p2 = pneg %p2671_p1 }
  0x1e   : > { %p2679_p8 = pnand %p2678_p7, %p2672_p2 }
  0x20   : > { %2682 = shalt.err (!%p2679_p8)
}
  0x21   : > { %s2770_s14 = smov [#allocation3]   ;;  %s2683_s16 = scalar_lea.vmem %s284_s27, 16 }
  0x22   : > { %2474 = dma.vmem_to_smem (!%p2895_p12), %s273_s24, 16, %s2770_s14, [#allocation5]  }
  0x23   : > { %p2684_p11 = scmp.ne.s32.totalorder %s284_s27, %s2683_s16  ;;  %p2691_p5 = scmp.lt.s32.totalorder %s284_s27, %s284_s27 }
  0x24   : > { %p2692_p10 = scmp.lt.s32.totalorder %s2683_s16, %s2683_s16 }
  0x25   : > { %p2686_p9 = pnand %p2684_p11, %p2670_p0 }
  0x26   : > { %p2693_p13 = por %p2692_p10, %p2691_p5 }
  0x27   : > { %p2687_p6 = pneg %p2686_p9 }
  0x29   : > { %p2694_p1 = pnand %p2693_p13, %p2687_p6 }
  0x2b   : > { %2697 = shalt.err (!%p2694_p1)
}
  0x2c   : > { %s2771_s17 = smov [#allocation6]   ;;  %p3865_p2 = scmp.ne.s32.totalorder %s3863_s21, 0 }
  0x2d   : > { %2477 = dma.vmem_to_smem (!%p2895_p12), %s284_s27, 16, %s2771_s17, [#allocation7]  }
  0x2e   : > { %335 = sbr.rel (%p3865_p2) target bundleno = 1188 (0x4a4), region = 56  ;;  %p3866_p3 = scmp.eq.s32.totalorder (!%p3865_p2), %s2853_s13, 0 }
  0x35   : > { %2743 = dma.done.wait (%p3866_p3), [#allocation5], 16   ;;  %p3867_p4 = pmov %p3866_p3 }
  0x36   : > { %p3868_p9 = pmov %p3866_p3 }
  0x37   : > { %2745 = vsyncadd (%p3867_p4), [#allocation5], 4294967280 }
  0x38   : > { %2747 = dma.done.wait (%p3868_p9), [#allocation7], 16   ;;  %p3869_p5 = pmov %p3866_p3 }
  0x3a   : > { %2749 = vsyncadd (%p3869_p5), [#allocation7], 4294967280 }
  0x3b   : > { %345 = sfence }
  0x3c   : > { %s2295_s22 = sshll.u32 %s2853_s13, 2  ;;  %s2293_s23 = sshll.u32 %s2853_s13, 5  ;;  %vm668_vm0 = vcmask 1041409   ;;  %vm671_vm1 = vcmask 1042434   ;;  %vm674_vm2 = vcmask 1043459   ;;  %vm677_vm3 = vcmask 1044484  }
  0x3d   : > { %p393_p6 = scmp.lt.s32.totalorder %s2295_s22, 7  ;;  %p387_p10 = scmp.lt.s32.totalorder %s2293_s23, 63  ;;  %vm680_vm4 = vcmask 1045509   ;;  %vm683_vm5 = vcmask 1046534   ;;  %vm686_vm6 = vcmask 1047559   ;;  %vm758_vm7 = vcmask 48128  }
  0x3e   : > { %s3870_s0 = sld [smem:[#allocation12_spill]]  ;;  %s2772_s16 = smov 22   ;;  %vm763_vm8 = vcmask 179200   ;;  %vm978_vm9 = vcmask 195584   ;;  %vm438_vm11 = vcmask 123904   ;;  %vm1811_vm12 = vcmask 261120  }
  0x3f   : > { %s3882_s22 = smov (!%p393_p6, %s2295_s22), 7  ;;  %s3884_s23 = smov (!%p387_p10, %s2293_s23), 63  ;;  %vm3494_vm10 = vmpackc.low %vm978_vm9, %vm978_vm9  ;;  %vm2138_vm13 = vcmask 162816   ;;  %vm2143_vm14 = vcmask 326656   ;;  %vm2148_vm15 = vcmask 490496  }
  0x40   : > { %s3857_s21 = sshll.u32 %s3882_s22, 3  ;;  %s2294_s27 = sshll.u32 %s3884_s23, 1 }
  0x41   : > { %s396_s26 = scalar_lea.vmem %s3845_s1, %s3857_s21  ;;  %s2773_s17 = smov 6  }
  0x42   : > { %v631_v0 = vld [vmem:[%s396_s26] sm:$0xff]  ;;  %v633_v1 = vld [vmem:[%s396_s26 + $0x10] sm:$0xff]  ;;  %v632_v2 = vld [vmem:[%s396_s26 + $0x8] sm:$0xff]  ;;  %s2305_s23 = sld [smem:[#allocation3 + $0x7]]  ;;  %s2299_s24 = sld [smem:[#allocation3 + $0x1]] }
  0x43   : > { %746 = vrot.lane.b32.xlu1 %v631_v0, %s2772_s16  ;;  %750 = vrot.lane.b32.xlu0 %v633_v1, %s2772_s16  ;;  %v634_v14 = vld [vmem:[%s396_s26 + $0x18] sm:$0xff]  ;;  %s2306_s25 = sld [smem:[#allocation3 + $0x8]]  ;;  %s2319_s26 = sld [smem:[#allocation3 + $0x13]] }
  0x44   : > { %s2928_s14 = scalar_lea.vmem %s3870_s0, %s2294_s27  ;;  %s2774_s27 = smov 127  }
  0x45   : > { %v406_v3 = vld [vmem:[%s2928_s14] sm:$0x3]  ;;  %v407_v4 = vld [vmem:[%s2928_s14 + $0x2] sm:$0x3]  ;;  %v408_v5 = vld [vmem:[%s2928_s14 + $0x4] sm:$0x3] }
  0x46   : > { %v409_v6 = vld [vmem:[%s2928_s14 + $0x6] sm:$0x3]  ;;  %v410_v7 = vld [vmem:[%s2928_s14 + $0x8] sm:$0x3]  ;;  %v411_v8 = vld [vmem:[%s2928_s14 + $0xa] sm:$0x3] }
  0x47   : > { %v535_v9 = vadd.f32 1.0, %v406_v3  ;;  %v536_v10 = vadd.f32 1.0, %v407_v4  ;;  %v537_v11 = vadd.f32 1.0, %v408_v5  ;;  %748 = vrot.lane.b32.xlu1 %v632_v2, %s2772_s16  ;;  %v412_v12 = vld [vmem:[%s2928_s14 + $0xc] sm:$0x3]  ;;  %v538_v13 = vadd.f32 1.0, %v409_v6 }
  0x48   : > { %v413_v15 = vld [vmem:[%s2928_s14 + $0xe] sm:$0x3]  ;;  %v539_v16 = vadd.f32 1.0, %v410_v7  ;;  %v540_v17 = vadd.f32 1.0, %v411_v8  ;;  %v414_v18 = vld [vmem:[%s2928_s14 + $0x10] sm:$0x3] }
  0x49   : > { %2564 = vlog2.f32 %v535_v9  ;;  %v541_v19 = vadd.f32 1.0, %v412_v12  ;;  %v415_v20 = vld [vmem:[%s2928_s14 + $0x12] sm:$0x3]  ;;  %v542_v21 = vadd.f32 1.0, %v413_v15  ;;  %v416_v22 = vld [vmem:[%s2928_s14 + $0x14] sm:$0x3] }
  0x4a   : > { %2566 = vlog2.f32 %v536_v10  ;;  %v417_v23 = vld [vmem:[%s2928_s14 + $0x16] sm:$0x3]  ;;  %v543_v24 = vadd.f32 1.0, %v414_v18  ;;  %v418_v25 = vld [vmem:[%s2928_s14 + $0x18] sm:$0x3]  ;;  %v544_v26 = vadd.f32 1.0, %v415_v20 }
  0x4b   : > { %2568 = vlog2.f32 %v537_v11  ;;  %752 = vrot.lane.b32.xlu1 %v634_v14, %s2772_s16  ;;  %v419_v27 = vld [vmem:[%s2928_s14 + $0x1a] sm:$0x3]  ;;  %v545_v28 = vadd.f32 1.0, %v416_v22  ;;  %v420_v29 = vld [vmem:[%s2928_s14 + $0x1c] sm:$0x3]  ;;  %v546_v30 = vadd.f32 1.0, %v417_v23 }
  0x4c   : > { %2570 = vlog2.f32 %v538_v13  ;;  %v421_v31 = vld [vmem:[%s2928_s14 + $0x1e] sm:$0x3]  ;;  %v547_v32 = vadd.f32 1.0, %v418_v25  ;;  %v422_v33 = vld [vmem:[%s2928_s14 + $0x20] sm:$0x3]  ;;  %v548_v34 = vadd.f32 1.0, %v419_v27 }
  0x4d   : > { %2572 = vlog2.f32 %v539_v16  ;;  %v423_v35 = vld [vmem:[%s2928_s14 + $0x22] sm:$0x3]  ;;  %v424_v36 = vld [vmem:[%s2928_s14 + $0x24] sm:$0x3]  ;;  %v549_v38 = vadd.f32 1.0, %v420_v29  ;;  %v550_v43 = vadd.f32 1.0, %v421_v31 }
  0x4e   : > { %2574 = vlog2.f32 %v540_v17  ;;  %v425_v39 = vld [vmem:[%s2928_s14 + $0x26] sm:$0x3]  ;;  %v426_v40 = vld [vmem:[%s2928_s14 + $0x28] sm:$0x3]  ;;  %v2951_v44 = vadd.f32 1.0, %v422_v33  ;;  %v2953_v47 = vadd.f32 1.0, %v423_v35 }
  0x4f   : > { %2576 = vlog2.f32 %v541_v19  ;;  %v2955_v48 = vadd.f32 1.0, %v424_v36  ;;  %v2957_v52 = vadd.f32 1.0, %v425_v39  ;;  %v2959_v56 = vadd.f32 1.0, %v426_v40  ;;  %s2300_s28 = sld [smem:[#allocation3 + $0x2]]  ;;  %s2312_s29 = sld [smem:[#allocation3 + $0xd]] }
  0x50   : > { %2578 = vlog2.f32 %v542_v21  ;;  %s3858_s16 = smov 126   ;;  %s2315_s21 = sld [smem:[#allocation3 + $0x10]] }
  0x51   : > { %2580 = vlog2.f32 %v543_v24  ;;  %s968_s0 = sld [smem:[#allocation6]]  ;;  %p3875_p0 = scmp.ne.s32.totalorder %s3861_s19, 0 }
  0x52   : > { %2582 = vlog2.f32 %v544_v26 }
  0x53   : > { %v2565_v37 = vpop.eup %2564  ;;  %2584 = vlog2.f32 %v545_v28 }
  0x54   : > { %v2567_v41 = vpop.eup %2566  ;;  %v568_v42 = vmul.f32 0.6931472, %v2565_v37  ;;  %2586 = vlog2.f32 %v546_v30 }
  0x55   : > { %v2569_v45 = vpop.eup %2568  ;;  %v570_v46 = vmul.f32 0.6931472, %v2567_v41  ;;  %2588 = vlog2.f32 %v547_v32 }
  0x56   : > { %v2571_v49 = vpop.eup %2570  ;;  %v572_v50 = vmul.f32 0.6931472, %v2569_v45  ;;  %2590 = vlog2.f32 %v548_v34  ;;  %v768_v51 = vrot.slane %v568_v42, 1 }
  0x57   : > { %v2573_v53 = vpop.eup %2572  ;;  %v574_v54 = vmul.f32 0.6931472, %v2571_v49  ;;  %v667_v55 = vrot.slane %v570_v46, 7  ;;  %2592 = vlog2.f32 %v549_v38 }
  0x58   : > { %v2575_v57 = vpop.eup %2574  ;;  %v576_v58 = vmul.f32 0.6931472, %v2573_v53  ;;  %v670_v59 = vrot.slane %v572_v50, 6  ;;  %2594 = vlog2.f32 %v550_v43  ;;  %v769_v60 = vsel %vm668_vm0, %v570_v46, %v768_v51 }
  0x59   : > { %v2577_v61 = vpop.eup %2576  ;;  %v2962_v62 = vmul.f32 0.6931472, %v2575_v57  ;;  %v669_v63 = vsel %vm668_vm0, %v667_v55, %v568_v42  ;;  %v673_v0 = vrot.slane %v574_v54, 5  ;;  %v770_v1 = vrot.slane %v572_v50, 7 }
  0x5a   : > { %v2579_v2 = vpop.eup %2578  ;;  %v2965_v3 = vmul.f32 0.6931472, %v2577_v61  ;;  %v672_v4 = vsel %vm671_vm1, %v670_v59, %v669_v63  ;;  %v676_v5 = vrot.slane %v576_v58, 4  ;;  %v772_v6 = vrot.slane %v574_v54, 6 }
  0x5b   : > { %v2581_v7 = vpop.eup %2580  ;;  %v2968_v8 = vmul.f32 0.6931472, %v2579_v2  ;;  %v675_v9 = vsel %vm674_vm2, %v673_v0, %v672_v4  ;;  %v679_v10 = vrot.slane %v2962_v62, 3  ;;  %v771_v11 = vsel %vm671_vm1, %v770_v1, %v769_v60  ;;  %v427_v0 = vld [vmem:[%s2928_s14 + $0x2a] sm:$0x3] }
  0x5c   : > { %v2583_v12 = vpop.eup %2582  ;;  %v678_v13 = vsel %vm677_vm3, %v676_v5, %v675_v9  ;;  %v682_v14 = vrot.slane %v2965_v3, 2  ;;  %v584_v15 = vmul.f32 0.6931472, %v2581_v7  ;;  %v773_v16 = vsel %vm674_vm2, %v772_v6, %v771_v11  ;;  %v428_v6 = vld [vmem:[%s2928_s14 + $0x2c] sm:$0x3] }
  0x5d   : > { %v2585_v17 = vpop.eup %2584  ;;  %v681_v18 = vsel %vm680_vm4, %v679_v10, %v678_v13  ;;  %v685_v19 = vrot.slane %v2968_v8, 1  ;;  %v586_v20 = vmul.f32 0.6931472, %v2583_v12  ;;  %v774_v21 = vrot.slane %v576_v58, 5  ;;  %v429_v11 = vld [vmem:[%s2928_s14 + $0x2e] sm:$0x3] }
  0x5e   : > { %v2587_v22 = vpop.eup %2586  ;;  %v684_v23 = vsel %vm683_vm5, %v682_v14, %v681_v18  ;;  %v588_v24 = vmul.f32 0.6931472, %v2585_v17  ;;  %v782_v25 = vrot.slane %v584_v15, 1  ;;  %v776_v26 = vrot.slane %v2962_v62, 4  ;;  %v430_v14 = vld [vmem:[%s2928_s14 + $0x30] sm:$0x3] }
  0x5f   : > { %v2589_v27 = vpop.eup %2588  ;;  %v687_v28 = vsel %vm686_vm6, %v685_v19, %v684_v23  ;;  %v590_v29 = vmul.f32 0.6931472, %v2587_v22  ;;  %v688_v30 = vrot.slane %v586_v20, 7  ;;  %v775_v31 = vsel %vm677_vm3, %v774_v21, %v773_v16  ;;  %v431_v16 = vld [vmem:[%s2928_s14 + $0x32] sm:$0x3] }
  0x60   : > { %v2591_v32 = vpop.eup %2590  ;;  %730 = vrot.lane.b32.xlu0 %v687_v28, %s2773_s17  ;;  %v592_v33 = vmul.f32 0.6931472, %v2589_v27  ;;  %v783_v34 = vsel %vm668_vm0, %v586_v20, %v782_v25  ;;  %v784_v35 = vrot.slane %v588_v24, 7  ;;  %v690_v36 = vrot.slane %v588_v24, 6  ;;  %v432_v17 = vld [vmem:[%s2928_s14 + $0x34] sm:$0x3] }
  0x61   : > { %v2593_v37 = vpop.eup %2592  ;;  %v594_v38 = vmul.f32 0.6931472, %v2591_v32  ;;  %v786_v39 = vrot.slane %v590_v29, 6  ;;  %v689_v40 = vsel %vm668_vm0, %v688_v30, %v584_v15  ;;  %v692_v41 = vrot.slane %v590_v29, 5  ;;  %v434_v20 = vld [vmem:[%s2928_s14 + $0x38] sm:$0x3] }
  0x62   : > { %v2595_v42 = vpop.eup %2594  ;;  %v596_v43 = vmul.f32 0.6931472, %v2593_v37  ;;  %v785_v45 = vsel %vm671_vm1, %v784_v35, %v783_v34  ;;  %v788_v46 = vrot.slane %v592_v33, 5  ;;  %v691_v49 = vsel %vm671_vm1, %v690_v36, %v689_v40  ;;  %v436_v23 = vld [vmem:[%s2928_s14 + $0x3c] sm:$0x3] }
  0x63   : > { %v598_v50 = vmul.f32 0.6931472, %v2595_v42  ;;  %v787_v51 = vsel %vm674_vm2, %v786_v39, %v785_v45  ;;  %v790_v53 = vrot.slane %v594_v38, 4  ;;  %v693_v54 = vsel %vm674_vm2, %v692_v41, %v691_v49  ;;  %v437_v25 = vld [vmem:[%s2928_s14 + $0x3e] sm:$0x3] }
  0x64   : > { %v789_v55 = vsel %vm677_vm3, %v788_v46, %v787_v51  ;;  %v792_v57 = vrot.slane %v596_v43, 3  ;;  %v694_v58 = vrot.slane %v592_v33, 4  ;;  %v696_v59 = vrot.slane %v594_v38, 3 }
  0x65   : > { %v791_v60 = vsel %vm680_vm4, %v790_v53, %v789_v55  ;;  %v794_v61 = vrot.slane %v598_v50, 2  ;;  %v698_v62 = vrot.slane %v596_v43, 2  ;;  %v700_v63 = vrot.slane %v598_v50, 1 }
  0x66   : > { %v793_v1 = vsel %vm683_vm5, %v792_v57, %v791_v60  ;;  %v695_v2 = vsel %vm677_vm3, %v694_v58, %v693_v54  ;;  %v777_v4 = vsel %vm680_vm4, %v776_v26, %v775_v31  ;;  %v778_v5 = vrot.slane %v2965_v3, 3 }
  0x67   : > { %v795_v7 = vsel %vm686_vm6, %v794_v61, %v793_v1  ;;  %v697_v9 = vsel %vm680_vm4, %v696_v59, %v695_v2  ;;  %v780_v10 = vrot.slane %v2968_v8, 2  ;;  %2596 = vlog2.f32 %v2951_v44 }
  0x68   : > { %826 = vrot.lane.b32.xlu1 %v795_v7, %s2773_s17  ;;  %v699_v12 = vsel %vm683_vm5, %v698_v62, %v697_v9  ;;  %v779_v13 = vsel %vm683_vm5, %v778_v5, %v777_v4  ;;  %v556_v3 = vadd.f32 1.0, %v427_v0  ;;  %2598 = vlog2.f32 %v2953_v47  ;;  %v433_v47 = vld [vmem:[%s2928_s14 + $0x36] sm:$0x3] }
  0x69   : > { %v701_v15 = vsel %vm686_vm6, %v700_v63, %v699_v12  ;;  %v557_v8 = vadd.f32 1.0, %v428_v6  ;;  %2600 = vlog2.f32 %v2955_v48  ;;  %v558_v44 = vadd.f32 1.0, %v429_v11  ;;  %v435_v48 = vld [vmem:[%s2928_s14 + $0x3a] sm:$0x3] }
  0x6a   : > { %732 = vrot.lane.b32.xlu0 %v701_v15, %s2773_s17  ;;  %2602 = vlog2.f32 %v2957_v52  ;;  %v781_v18 = vsel %vm686_vm6, %v780_v10, %v779_v13  ;;  %v559_v19 = vadd.f32 1.0, %v430_v14  ;;  %v560_v21 = vadd.f32 1.0, %v431_v16 }
  0x6b   : > { %2604 = vlog2.f32 %v2959_v56  ;;  %v561_v22 = vadd.f32 1.0, %v432_v17  ;;  %v562_v24 = vadd.f32 1.0, %v433_v47  ;;  %v563_v52 = vadd.f32 1.0, %v434_v20 }
  0x6c   : > { %2606 = vlog2.f32 %v556_v3  ;;  %v564_v26 = vadd.f32 1.0, %v435_v48  ;;  %v565_v56 = vadd.f32 1.0, %v436_v23  ;;  %v566_v38 = vadd.f32 1.0, %v437_v25 }
  0x6d   : > { %2608 = vlog2.f32 %v557_v8 }
  0x6e   : > { %824 = vrot.lane.b32.xlu0 %v781_v18, %s2773_s17  ;;  %2610 = vlog2.f32 %v558_v44 }
  0x6f   : > { %2612 = vlog2.f32 %v559_v19 }
  0x70   : > { %2614 = vlog2.f32 %v560_v21 }
  0x71   : > { %v2597_v27 = vpop.eup %2596  ;;  %2616 = vlog2.f32 %v561_v22 }
  0x72   : > { %v2599_v28 = vpop.eup %2598  ;;  %v600_v29 = vmul.f32 0.6931472, %v2597_v27  ;;  %2618 = vlog2.f32 %v562_v24 }
  0x73   : > { %v2601_v30 = vpop.eup %2600  ;;  %v602_v31 = vmul.f32 0.6931472, %v2599_v28  ;;  %2620 = vlog2.f32 %v563_v52 }
  0x74   : > { %v2603_v32 = vpop.eup %2602  ;;  %v604_v33 = vmul.f32 0.6931472, %v2601_v30  ;;  %v796_v34 = vrot.slane %v600_v29, 1  ;;  %2622 = vlog2.f32 %v564_v26 }
  0x75   : > { %v2605_v35 = vpop.eup %2604  ;;  %v606_v36 = vmul.f32 0.6931472, %v2603_v32  ;;  %v702_v37 = vrot.slane %v602_v31, 7  ;;  %2624 = vlog2.f32 %v565_v56 }
  0x76   : > { %v2607_v39 = vpop.eup %2606  ;;  %v608_v40 = vmul.f32 0.6931472, %v2605_v35  ;;  %v704_v41 = vrot.slane %v604_v33, 6  ;;  %v797_v42 = vsel %vm668_vm0, %v602_v31, %v796_v34  ;;  %v798_v43 = vrot.slane %v604_v33, 7 }
  0x77   : > { %v2609_v45 = vpop.eup %2608  ;;  %v610_v46 = vmul.f32 0.6931472, %v2607_v39  ;;  %v703_v49 = vsel %vm668_vm0, %v702_v37, %v600_v29  ;;  %v706_v50 = vrot.slane %v606_v36, 5  ;;  %v800_v51 = vrot.slane %v606_v36, 6 }
  0x78   : > { %v2611_v53 = vpop.eup %2610  ;;  %v612_v54 = vmul.f32 0.6931472, %v2609_v45  ;;  %v705_v55 = vsel %vm671_vm1, %v704_v41, %v703_v49  ;;  %v708_v57 = vrot.slane %v608_v40, 4  ;;  %v799_v58 = vsel %vm671_vm1, %v798_v43, %v797_v42 }
  0x79   : > { %v2613_v59 = vpop.eup %2612  ;;  %v614_v60 = vmul.f32 0.6931472, %v2611_v53  ;;  %v707_v61 = vsel %vm674_vm2, %v706_v50, %v705_v55  ;;  %v710_v62 = vrot.slane %v610_v46, 3  ;;  %v801_v63 = vsel %vm674_vm2, %v800_v51, %v799_v58 }
  0x7a   : > { %v2615_v0 = vpop.eup %2614  ;;  %v709_v1 = vsel %vm677_vm3, %v708_v57, %v707_v61  ;;  %v712_v2 = vrot.slane %v612_v54, 2  ;;  %v802_v4 = vrot.slane %v608_v40, 5  ;;  %v804_v5 = vrot.slane %v610_v46, 4 }
  0x7b   : > { %v2617_v6 = vpop.eup %2616  ;;  %v711_v7 = vsel %vm680_vm4, %v710_v62, %v709_v1  ;;  %v714_v9 = vrot.slane %v614_v60, 1  ;;  %v806_v10 = vrot.slane %v612_v54, 3  ;;  %v808_v11 = vrot.slane %v614_v60, 2 }
  0x7c   : > { %v2619_v12 = vpop.eup %2618  ;;  %v713_v13 = vsel %vm683_vm5, %v712_v2, %v711_v7  ;;  %v803_v3 = vsel %vm677_vm3, %v802_v4, %v801_v63  ;;  %v616_v14 = vmul.f32 0.6931472, %v2613_v59  ;;  %v618_v15 = vmul.f32 0.6931472, %v2615_v0 }
  0x7d   : > { %v2621_v8 = vpop.eup %2620  ;;  %v715_v16 = vsel %vm686_vm6, %v714_v9, %v713_v13  ;;  %v805_v44 = vsel %vm680_vm4, %v804_v5, %v803_v3  ;;  %v620_v17 = vmul.f32 0.6931472, %v2617_v6  ;;  %v622_v18 = vmul.f32 0.6931472, %v2619_v12 }
  0x7e   : > { %v2623_v47 = vpop.eup %2622  ;;  %734 = vrot.lane.b32.xlu0 %v715_v16, %s2773_s17  ;;  %v807_v19 = vsel %vm683_vm5, %v806_v10, %v805_v44  ;;  %v624_v20 = vmul.f32 0.6931472, %v2621_v8  ;;  %2626 = vlog2.f32 %v566_v38  ;;  %v716_v21 = vrot.slane %v618_v15, 7 }
  0x7f   : > { %v2625_v48 = vpop.eup %2624  ;;  %v809_v22 = vsel %vm686_vm6, %v808_v11, %v807_v19  ;;  %v626_v23 = vmul.f32 0.6931472, %v2623_v47  ;;  %v718_v24 = vrot.slane %v620_v17, 6  ;;  %v720_v52 = vrot.slane %v622_v18, 5 }
  0x80   : > { %v628_v25 = vmul.f32 0.6931472, %v2625_v48  ;;  %v717_v26 = vsel %vm668_vm0, %v716_v21, %v616_v14  ;;  %v722_v27 = vrot.slane %v624_v20, 4  ;;  %v810_v56 = vrot.slane %v616_v14, 1 }
  0x81   : > { %v719_v28 = vsel %vm671_vm1, %v718_v24, %v717_v26  ;;  %v724_v29 = vrot.slane %v626_v23, 3  ;;  %v812_v30 = vrot.slane %v620_v17, 7  ;;  %v814_v31 = vrot.slane %v622_v18, 6 }
  0x82   : > { %828 = vrot.lane.b32.xlu0 %v809_v22, %s2773_s17  ;;  %v721_v32 = vsel %vm674_vm2, %v720_v52, %v719_v28  ;;  %v726_v33 = vrot.slane %v628_v25, 2  ;;  %v811_v34 = vsel %vm668_vm0, %v618_v15, %v810_v56  ;;  %v816_v35 = vrot.slane %v624_v20, 5  ;;  %v2531_v56 = vld [vmem:[%s3849_s5] sm:$0xff]  }
  0x83   : > { %v813_v36 = vsel %vm671_vm1, %v812_v30, %v811_v34  ;;  %v818_v37 = vrot.slane %v626_v23, 4  ;;  %v820_v38 = vrot.slane %v628_v25, 3  ;;  %v723_v39 = vsel %vm677_vm3, %v722_v27, %v721_v32  ;;  %v2530_v27 = vld [vmem:[%s3849_s5 + $0x40] sm:$0xff]  }
  0x84   : > { %v815_v40 = vsel %vm674_vm2, %v814_v31, %v813_v36  ;;  %v725_v42 = vsel %vm680_vm4, %v724_v29, %v723_v39  ;;  %v3055_v59 = vstv %s2305_s23  ;;  %v3063_v0 = vstv %s2299_s24  ;;  %s2313_s23 = sld [smem:[#allocation3 + $0xe]]  ;;  %s2308_s24 = sld [smem:[#allocation3 + $0xa]]  ;;  %2393 = vmatprep.subr.bf16.mxu0 %v2530_v27  ;;  %v2543_v27 = vld [vmem:[%s3849_s5 + $0x30] sm:$0xff]  }
  0x85   : > { %v817_v41 = vsel %vm677_vm3, %v816_v35, %v815_v40  ;;  %v727_v49 = vsel %vm683_vm5, %v726_v33, %v725_v42  ;;  %v3068_v2 = vstv %s2306_s25  ;;  %v3080_v10 = vstv %s2319_s26  ;;  %s2302_s25 = sld [smem:[#allocation3 + $0x4]]  ;;  %2394 = vmatpush3.bf16.msra.mxu0 %v2531_v56  ;;  %v2544_v56 = vld [vmem:[%s3849_s5 + $0x78] sm:$0xff]   ;;  %s2301_s26 = sld [smem:[#allocation3 + $0x3]] }
  0x86   : > { %v819_v46 = vsel %vm680_vm4, %v818_v37, %v817_v41  ;;  %v3088_v13 = vstv %s2300_s28  ;;  %v3096_v15 = vstv %s2312_s29  ;;  %v2532_v37 = vld [vmem:[%s3849_s5 + $0x48] sm:$0xff]   ;;  %s2322_s29 = sld [smem:[#allocation3 + $0x16]]  ;;  %s2303_s28 = sld [smem:[#allocation3 + $0x5]] }
  0x87   : > { %v821_v53 = vsel %vm683_vm5, %v820_v38, %v819_v46  ;;  %v2533_v38 = vld [vmem:[%s3849_s5 + $0x8] sm:$0xff]   ;;  %2395 = vmatprep.subr.bf16.mxu0 %v2532_v37  ;;  %v2535_v46 = vld [vmem:[%s3849_s5 + $0x10] sm:$0xff]  }
  0x88   : > { %v2627_v43 = vpop.eup %2626  ;;  %v2549_v37 = vld [vmem:[%s3849_s5 + $0x88] sm:$0xff]  }
  0x89   : > { %v630_v45 = vmul.f32 0.6931472, %v2627_v43  ;;  %2396 = vmatpush3.bf16.msra.mxu0 %v2533_v38  ;;  %v2550_v38 = vld [vmem:[%s3849_s5 + $0xd0] sm:$0xff]  }
  0x8a   : > { %v3112_v19 = vstv %s2313_s23  ;;  %v1060_v26 = vstv %s2308_s24  ;;  %s2309_s23 = sld [smem:[#allocation3 + $0xb]]  ;;  %s3871_s24 = smov 126  }
  0x8b   : > { %v728_v50 = vrot.slane %v630_v45, 1  ;;  %v822_v51 = vrot.slane %v630_v45, 2  ;;  %v917_v32 = vstv %s2302_s25  ;;  %v2534_v45 = vld [vmem:[%s3849_s5 + $0x50] sm:$0xff]   ;;  %s2323_s25 = sld [smem:[#allocation3 + $0x17]] }
  0x8c   : > { %2397 = vmatprep.subr.bf16.mxu0 %v2534_v45 }
  0x8d   : > { %v729_v54 = vsel %vm686_vm6, %v728_v50, %v727_v49  ;;  %v823_v55 = vsel %vm686_vm6, %v822_v51, %v821_v53  ;;  %2398 = vmatpush3.bf16.msra.mxu0 %v2535_v46 }
  0x8e   : > { %736 = vrot.lane.b32.xlu1 %v729_v54, %s2773_s17 }
  0x90   : > { %v3183_v53 = vstv %s2309_s23  ;;  %s2324_s23 = sld [smem:[#allocation6 + $0x3]] }
  0x91   : > { %v3312_v45 = vstv %s2323_s25  ;;  %s2304_s25 = sld [smem:[#allocation3 + $0x6]] }
  0x92   : > { %830 = vrot.lane.b32.xlu1 %v823_v55, %s2773_s17  ;;  %s2320_s17 = sld [smem:[#allocation3 + $0x14]] }
  0x98   : > { %v3104_v17 = vstv %s2320_s17  ;;  %s2307_s17 = sld [smem:[#allocation3 + $0x9]] }
  0xb5   : > { %v3053_v57 = vpop.permute.xlu0 %750  ;;  %v747_v60 = vpop.permute.xlu1 %746 }
  0xb9   : > { %v3071_v5 = vpop.permute.xlu1 %748 }
  0xbd   : > { %v3118_v48 = vpop.permute.xlu1 %752 }
  0xd2   : > { %v731_v58 = vpop.permute.xlu0 %730 }
  0xd3   : > { %v759_v61 = vsel %vm758_vm7, 0.0, %v731_v58 }
  0xd4   : > { %v3059_v62 = vsel %vm763_vm8, %v759_v61, %v747_v60  ;;  %v3195_v61 = vstv %s2322_s29  ;;  %s2316_s29 = sld [smem:[#allocation3 + $0x11]] }
  0xd5   : > { %v999_v63 = vmul.f32 %v3055_v59, %v3059_v62  ;;  %v856_v1 = vmul.f32 %v3063_v0, %v3059_v62  ;;  %v1025_v7 = vmul.f32 %v3068_v2, %v3059_v62  ;;  %v1283_v12 = vmul.f32 %v3080_v10, %v3059_v62 }
  0xd6   : > { %v882_v14 = vmul.f32 %v3088_v13, %v3059_v62  ;;  %v1141_v16 = vmul.f32 %v3096_v15, %v3059_v62  ;;  %v1309_v47 = vmul.f32 %v3104_v17, %v3059_v62  ;;  %v1167_v23 = vmul.f32 %v3112_v19, %v3059_v62 }
  0xd7   : > { %1007 = vrot.lane.b32.xlu0 %v999_v63, %s2774_s27  ;;  %v2536_v63 = vld [vmem:[%s3849_s5 + $0x58] sm:$0xff]  }
  0xd8   : > { %2399 = vmatprep.subr.bf16.mxu0 %v2536_v63 }
  0xda   : > { %v827_v30 = vpop.permute.xlu1 %826 }
  0xdb   : > { %864 = vrot.lane.b32.xlu0 %v856_v1, %s2774_s27  ;;  %v837_v39 = vsel %vm758_vm7, 0.0, %v827_v30  ;;  %v2537_v1 = vld [vmem:[%s3849_s5 + $0x18] sm:$0xff]   ;;  %v2547_v30 = vld [vmem:[%s3849_s5 + $0x80] sm:$0xff]  }
  0xdc   : > { %v733_v4 = vpop.permute.xlu0 %732  ;;  %v3170_v43 = vsel %vm763_vm8, %v837_v39, %v3071_v5  ;;  %2400 = vmatpush3.bf16.msra.mxu0 %v2537_v1  ;;  %v2557_v1 = vld [vmem:[%s3849_s5 + $0xa8] sm:$0xff]  }
  0xdd   : > { %v760_v6 = vsel %vm758_vm7, 0.0, %v733_v4  ;;  %v1062_v50 = vmul.f32 %v1060_v26, %v3170_v43  ;;  %v919_v58 = vmul.f32 %v917_v32, %v3170_v43 }
  0xde   : > { %v3078_v9 = vsel %vm763_vm8, %v760_v6, %v3071_v5  ;;  %v2538_v6 = vld [vmem:[%s3849_s5 + $0x60] sm:$0xff]  }
  0xdf   : > { %v1000_v11 = vmul.f32 %v3055_v59, %v3078_v9  ;;  %1033 = vrot.lane.b32.xlu0 %v1025_v7, %s3858_s16  ;;  %v857_v3 = vmul.f32 %v3063_v0, %v3078_v9  ;;  %v1026_v8 = vmul.f32 %v3068_v2, %v3078_v9  ;;  %v1284_v18 = vmul.f32 %v3080_v10, %v3078_v9 }
  0xe0   : > { %v825_v44 = vpop.permute.xlu0 %824  ;;  %v883_v21 = vmul.f32 %v3088_v13, %v3078_v9  ;;  %v1142_v52 = vmul.f32 %v3096_v15, %v3078_v9  ;;  %v1310_v34 = vmul.f32 %v3104_v17, %v3078_v9  ;;  %v1168_v42 = vmul.f32 %v3112_v19, %v3078_v9  ;;  %2401 = vmatprep.subr.bf16.mxu0 %v2538_v6 }
  0xe1   : > { %1009 = vrot.lane.b32.xlu1 %v1000_v11, %s2774_s27  ;;  %v836_v20 = vsel %vm758_vm7, 0.0, %v825_v44 }
  0xe2   : > { %v3124_v24 = vsel %vm763_vm8, %v836_v20, %v747_v60 }
  0xe3   : > { %1291 = vrot.lane.b32.xlu0 %v1283_v12, %s2774_s27  ;;  %v1061_v29 = vmul.f32 %v1060_v26, %v3124_v24  ;;  %v918_v40 = vmul.f32 %v917_v32, %v3124_v24  ;;  %v1087_v55 = vmul.f32 %v3183_v53, %v3124_v24  ;;  %v1345_v5 = vmul.f32 %v3195_v61, %v3124_v24 }
  0xe4   : > { %v3216_v12 = vstv %s2303_s28  ;;  %v1371_v46 = vmul.f32 %v3312_v45, %v3124_v24  ;;  %s2321_s28 = sld [smem:[#allocation3 + $0x15]] }
  0xe5   : > { %866 = vrot.lane.b32.xlu1 %v857_v3, %s2774_s27  ;;  %v3218_v3 = vstv %s2315_s21  ;;  %s2318_s21 = sld [smem:[#allocation3 + $0x12]] }
  0xe7   : > { %890 = vrot.lane.b32.xlu0 %v882_v14, %s3858_s16 }
  0xe9   : > { %1035 = vrot.lane.b32.xlu1 %v1026_v8, %s3858_s16 }
  0xeb   : > { %1149 = vrot.lane.b32.xlu0 %v1141_v16, %s2774_s27 }
  0xed   : > { %1293 = vrot.lane.b32.xlu1 %v1284_v18, %s2774_s27 }
  0xef   : > { %1317 = vrot.lane.b32.xlu0 %v1309_v47, %s3858_s16  ;;  %v2539_v47 = vld [vmem:[%s3849_s5 + $0x20] sm:$0xff]  }
  0xf0   : > { %v735_v22 = vpop.permute.xlu0 %734  ;;  %2402 = vmatpush3.bf16.msra.mxu0 %v2539_v47  ;;  %v2558_v47 = vld [vmem:[%s3849_s5 + $0xf0] sm:$0xff]  }
  0xf1   : > { %892 = vrot.lane.b32.xlu1 %v883_v21, %s3858_s16  ;;  %v761_v33 = vsel %vm758_vm7, 0.0, %v735_v22  ;;  %v2540_v21 = vld [vmem:[%s3849_s5 + $0x68] sm:$0xff]  }
  0xf2   : > { %v3163_v41 = vsel %vm763_vm8, %v761_v33, %v3053_v57  ;;  %v2541_v22 = vld [vmem:[%s3849_s5 + $0x28] sm:$0xff]   ;;  %2403 = vmatprep.subr.bf16.mxu0 %v2540_v21  ;;  %v2546_v33 = vld [vmem:[%s3849_s5 + $0x38] sm:$0xff]  }
  0xf3   : > { %1175 = vrot.lane.b32.xlu0 %v1167_v23, %s3858_s16  ;;  %v1001_v49 = vmul.f32 %v3055_v59, %v3163_v41  ;;  %v858_v20 = vmul.f32 %v3063_v0, %v3163_v41  ;;  %v944_v23 = vmul.f32 %v3216_v12, %v3124_v24  ;;  %v1285_v39 = vmul.f32 %v3080_v10, %v3163_v41 }
  0xf4   : > { %v829_v25 = vpop.permute.xlu0 %828  ;;  %2404 = vmatpush3.bf16.msra.mxu0 %v2541_v22  ;;  %v1143_v63 = vmul.f32 %v3096_v15, %v3163_v41  ;;  %v2561_v22 = vld [vmem:[%s3849_s5 + $0xb8] sm:$0xff]  }
  0xf5   : > { %v838_v28 = vsel %vm758_vm7, 0.0, %v829_v25  ;;  %1151 = vrot.lane.b32.xlu1 %v1142_v52, %s2774_s27  ;;  %v1346_v52 = vmul.f32 %v3195_v61, %v3170_v43  ;;  %v1203_v25 = vmul.f32 %v3218_v3, %v3124_v24 }
  0xf6   : > { %v3140_v31 = vsel %vm763_vm8, %v838_v28, %v3053_v57 }
  0xf7   : > { %1069 = vrot.lane.b32.xlu0 %v1061_v29, %s2774_s27  ;;  %v3147_v35 = vmul.f32 %v1060_v26, %v3140_v31  ;;  %v3150_v36 = vmul.f32 %v917_v32, %v3140_v31  ;;  %v2545_v29 = vld [vmem:[%s3849_s5 + $0xc0] sm:$0xff]  }
  0xf8   : > { %2421 = vmatprep.subr.bf16.mxu1 %v2545_v29 }
  0xf9   : > { %1319 = vrot.lane.b32.xlu1 %v1310_v34, %s3858_s16  ;;  %v945_v34 = vmul.f32 %v3216_v12, %v3170_v43  ;;  %2422 = vmatpush3.bf16.msra.mxu1 %v2547_v30 }
  0xfb   : > { %926 = vrot.lane.b32.xlu0 %v918_v40, %s2774_s27  ;;  %v1204_v40 = vmul.f32 %v3218_v3, %v3170_v43 }
  0xfd   : > { %1177 = vrot.lane.b32.xlu1 %v1168_v42, %s3858_s16  ;;  %v2551_v42 = vld [vmem:[%s3849_s5 + $0x90] sm:$0xff]  }
  0xff   : > { %1011 = vrot.lane.b32.xlu0 %v1001_v49, %s2774_s27 }
 0x100   : > { %v737_v51 = vpop.permute.xlu1 %736 }
 0x101   : > { %v762_v54 = vsel %vm758_vm7, 0.0, %v737_v51  ;;  %1071 = vrot.lane.b32.xlu1 %v1062_v50, %s2774_s27  ;;  %v2552_v50 = vld [vmem:[%s3849_s5 + $0xd8] sm:$0xff]  }
 0x102   : > { %v3191_v57 = vsel %vm763_vm8, %v762_v54, %v3118_v48  ;;  %v2553_v51 = vld [vmem:[%s3849_s5 + $0x98] sm:$0xff]   ;;  %v2554_v54 = vld [vmem:[%s3849_s5 + $0xe0] sm:$0xff]  }
 0x103   : > { %1095 = vrot.lane.b32.xlu0 %v1087_v55, %s3858_s16  ;;  %v1002_v11 = vmul.f32 %v3055_v59, %v3191_v57  ;;  %v859_v28 = vmul.f32 %v3063_v0, %v3191_v57  ;;  %v1027_v0 = vmul.f32 %v3068_v2, %v3163_v41  ;;  %v1028_v49 = vmul.f32 %v3068_v2, %v3191_v57  ;;  %s2311_s16 = sld [smem:[#allocation3 + $0xc]] }
 0x104   : > { %v831_v60 = vpop.permute.xlu1 %830  ;;  %v884_v2 = vmul.f32 %v3088_v13, %v3163_v41  ;;  %v1286_v55 = vmul.f32 %v3080_v10, %v3191_v57  ;;  %v1372_v10 = vmul.f32 %v3312_v45, %v3170_v43  ;;  %v885_v6 = vmul.f32 %v3088_v13, %v3191_v57  ;;  %v2560_v13 = vld [vmem:[%s3849_s5 + $0xf8] sm:$0xff]  }
 0x105   : > { %v839_v4 = vsel %vm758_vm7, 0.0, %v831_v60  ;;  %928 = vrot.lane.b32.xlu1 %v919_v58, %s2774_s27  ;;  %v2555_v58 = vld [vmem:[%s3849_s5 + $0xa0] sm:$0xff]   ;;  %v2556_v60 = vld [vmem:[%s3849_s5 + $0xe8] sm:$0xff]   ;;  %v1144_v21 = vmul.f32 %v3096_v15, %v3191_v57  ;;  %v1312_v15 = vmul.f32 %v3104_v17, %v3191_v57 }
 0x106   : > { %v3212_v7 = vsel %vm763_vm8, %v839_v4, %v3118_v48  ;;  %v1088_v48 = vmul.f32 %v3183_v53, %v3170_v43  ;;  %v3350_v4 = vstv %s2316_s29  ;;  %s844_s29 = sld [smem:[#allocation3]] }
 0x107   : > { %1353 = vrot.lane.b32.xlu0 %v1345_v5, %s2774_s27  ;;  %v3222_v14 = vmul.f32 %v1060_v26, %v3212_v7  ;;  %v3225_v8 = vmul.f32 %v917_v32, %v3212_v7  ;;  %v3229_v16 = vmul.f32 %v3183_v53, %v3212_v7  ;;  %v3233_v59 = vmul.f32 %v3195_v61, %v3212_v7  ;;  %v2542_v26 = vld [vmem:[%s3849_s5 + $0x70] sm:$0xff]   ;;  %v2548_v32 = vld [vmem:[%s3849_s5 + $0xc8] sm:$0xff]  }
 0x108   : > { %v3237_v44 = vmul.f32 %v3216_v12, %v3212_v7  ;;  %v3241_v18 = vmul.f32 %v3218_v3, %v3212_v7  ;;  %2405 = vmatprep.subr.bf16.mxu0 %v2542_v26  ;;  %2423 = vmatprep.subr.bf16.mxu1 %v2548_v32  ;;  %v1229_v5 = vmul.f32 %v3350_v4, %v3124_v24  ;;  %v3424_v26 = vstv %s2307_s17 }
 0x109   : > { %1013 = vrot.lane.b32.xlu1 %v1002_v11, %s2774_s27  ;;  %2406 = vmatpush3.bf16.msra.mxu0 %v2543_v27  ;;  %v1311_v11 = vmul.f32 %v3104_v17, %v3163_v41  ;;  %v1347_v17 = vmul.f32 %v3195_v61, %v3140_v31  ;;  %v1051_v27 = vmul.f32 %v3424_v26, %v3124_v24 }
 0x10a   : > { %2407 = vmatprep.subr.bf16.mxu0 %v2544_v56  ;;  %2424 = vmatpush3.bf16.msra.mxu1 %v2549_v37 }
 0x10b   : > { %868 = vrot.lane.b32.xlu0 %v858_v20, %s2774_s27  ;;  %2425 = vmatprep.subr.bf16.mxu1 %v2550_v38  ;;  %v2559_v20 = vld [vmem:[%s3849_s5 + $0xb0] sm:$0xff]   ;;  %v3442_v38 = vstv %s2301_s26  ;;  %s2778_s26 = smov 40  }
 0x10d   : > { %1097 = vrot.lane.b32.xlu1 %v1088_v48, %s3871_s24  ;;  %2408 = vmatpush3.bf16.msra.mxu0 %v2546_v33  ;;  %v1169_v48 = vmul.f32 %v3112_v19, %v3163_v41 }
 0x10e   : > { %2426 = vmatpush3.bf16.msra.mxu1 %v2551_v42 }
 0x10f   : > { %952 = vrot.lane.b32.xlu0 %v944_v23, %s3871_s24  ;;  %2427 = vmatprep.subr.bf16.mxu1 %v2552_v50  ;;  %v1230_v23 = vmul.f32 %v3350_v4, %v3170_v43  ;;  %v1052_v50 = vmul.f32 %v3424_v26, %v3170_v43 }
 0x111   : > { %1355 = vrot.lane.b32.xlu1 %v1346_v52, %s2774_s27  ;;  %v1170_v52 = vmul.f32 %v3112_v19, %v3191_v57  ;;  %v946_v19 = vmul.f32 %v3216_v12, %v3140_v31  ;;  %v1373_v12 = vmul.f32 %v3312_v45, %v3140_v31 }
 0x112   : > { %2428 = vmatpush3.bf16.msra.mxu1 %v2553_v51 }
 0x113   : > { %1211 = vrot.lane.b32.xlu0 %v1203_v25, %s2774_s27  ;;  %2429 = vmatprep.subr.bf16.mxu1 %v2554_v54  ;;  %v1089_v25 = vmul.f32 %v3183_v53, %v3140_v31  ;;  %v3410_v53 = vstv %s2304_s25  ;;  %s2317_s25 = sld [smem:[#allocation6 + $0x2]] }
 0x114   : > { %v990_v33 = vmul.f32 %v3410_v53, %v3078_v9 }
 0x115   : > { %870 = vrot.lane.b32.xlu1 %v859_v28, %s2774_s27  ;;  %v3428_v28 = vstv %s844_s29  ;;  %s2777_s29 = smov 108  }
 0x116   : > { %2430 = vmatpush3.bf16.msra.mxu1 %v2555_v58  ;;  %v846_v30 = vmul.f32 %v3428_v28, %v3059_v62 }
 0x117   : > { %1037 = vrot.lane.b32.xlu0 %v1027_v0, %s3871_s24  ;;  %2431 = vmatprep.subr.bf16.mxu1 %v2556_v60  ;;  %v1374_v0 = vmul.f32 %v3312_v45, %v3212_v7  ;;  %v1232_v45 = vmul.f32 %v3350_v4, %v3212_v7  ;;  %v3457_v60 = vstv %s2311_s16  ;;  %s3874_s16 = sshll.u32 %s3882_s22, 3 }
 0x119   : > { %954 = vrot.lane.b32.xlu1 %v945_v34, %s3871_s24 }
 0x11a   : > { %2432 = vmatpush3.bf16.msra.mxu1 %v2557_v1 }
 0x11b   : > { %1295 = vrot.lane.b32.xlu0 %v1285_v39, %s2774_s27  ;;  %2433 = vmatprep.subr.bf16.mxu1 %v2558_v47 }
 0x11d   : > { %1213 = vrot.lane.b32.xlu1 %v1204_v40, %s2774_s27  ;;  %v908_v40 = vmul.f32 %v3442_v38, %v3124_v24 }
 0x11e   : > { %2434 = vmatpush3.bf16.msra.mxu1 %v2559_v20 }
 0x11f   : > { %1379 = vrot.lane.b32.xlu0 %v1371_v46, %s3871_s24  ;;  %2435 = vmatprep.subr.bf16.mxu1 %v2560_v13  ;;  %v3446_v46 = vstv %s2318_s21 }
 0x121   : > { %1039 = vrot.lane.b32.xlu1 %v1028_v49, %s3871_s24 }
 0x122   : > { %2436 = vmatpush3.bf16.msra.mxu1 %v2561_v22 }
 0x123   : > { %894 = vrot.lane.b32.xlu0 %v884_v2, %s3871_s24  ;;  %v1273_v2 = vmul.f32 %v3446_v46, %v3059_v62 }
 0x125   : > { %1297 = vrot.lane.b32.xlu1 %v1286_v55, %s2774_s27 }
 0x127   : > { %1153 = vrot.lane.b32.xlu0 %v1143_v63, %s2774_s27  ;;  %v847_v63 = vmul.f32 %v3428_v28, %v3078_v9 }
 0x129   : > { %1381 = vrot.lane.b32.xlu1 %v1372_v10, %s3871_s24 }
 0x12b   : > { %1237 = vrot.lane.b32.xlu0 %v1229_v5, %s3871_s24 }
 0x12d   : > { %896 = vrot.lane.b32.xlu1 %v885_v6, %s3871_s24  ;;  %v1131_v6 = vmul.f32 %v3457_v60, %v3059_v62 }
 0x12f   : > { %1321 = vrot.lane.b32.xlu0 %v1311_v11, %s3871_s24 }
 0x131   : > { %1155 = vrot.lane.b32.xlu1 %v1144_v21, %s2774_s27 }
 0x133   : > { %1179 = vrot.lane.b32.xlu0 %v1169_v48, %s3871_s24  ;;  %v909_v48 = vmul.f32 %v3442_v38, %v3170_v43 }
 0x135   : > { %1239 = vrot.lane.b32.xlu1 %v1230_v23, %s3871_s24 }
 0x137   : > { %1073 = vrot.lane.b32.xlu0 %v3147_v35, %s2774_s27 }
 0x139   : > { %1323 = vrot.lane.b32.xlu1 %v1312_v15, %s3871_s24 }
 0x13b   : > { %930 = vrot.lane.b32.xlu0 %v3150_v36, %s2774_s27  ;;  %v1205_v36 = vmul.f32 %v3218_v3, %v3140_v31 }
 0x13d   : > { %1181 = vrot.lane.b32.xlu1 %v1170_v52, %s3871_s24 }
 0x13f   : > { %1099 = vrot.lane.b32.xlu0 %v1089_v25, %s3871_s24 }
 0x141   : > { %1075 = vrot.lane.b32.xlu1 %v3222_v14, %s2774_s27  ;;  %v989_v14 = vmul.f32 %v3410_v53, %v3059_v62 }
 0x143   : > { %1357 = vrot.lane.b32.xlu0 %v1347_v17, %s2774_s27 }
 0x145   : > { %932 = vrot.lane.b32.xlu1 %v3225_v8, %s2774_s27 }
 0x147   : > { %956 = vrot.lane.b32.xlu0 %v946_v19, %s3871_s24  ;;  %v1274_v19 = vmul.f32 %v3446_v46, %v3078_v9 }
 0x149   : > { %1101 = vrot.lane.b32.xlu1 %v3229_v16, %s3871_s24  ;;  %v1008_v35 = vpop.permute.xlu0 %1007  ;;  %v1231_v16 = vmul.f32 %v3350_v4, %v3140_v31  ;;  %v3461_v4 = vstv %s2321_s28 }
 0x14a   : > { %v1019_v8 = vadd.f32 %v1008_v35, %v989_v14  ;;  %v1335_v47 = vmul.f32 %v3461_v4, %v3124_v24  ;;  %v1132_v14 = vmul.f32 %v3457_v60, %v3078_v9 }
 0x14b   : > { %1215 = vrot.lane.b32.xlu0 %v1205_v36, %s2774_s27 }
 0x14d   : > { %1359 = vrot.lane.b32.xlu1 %v3233_v59, %s2774_s27  ;;  %v865_v61 = vpop.permute.xlu0 %864 }
 0x14e   : > { %v876_v34 = vadd.f32 %v865_v61, %v846_v30 }
 0x14f   : > { %1383 = vrot.lane.b32.xlu0 %v1373_v12, %s3871_s24 }
 0x151   : > { %958 = vrot.lane.b32.xlu1 %v3237_v44, %s3871_s24  ;;  %v1034_v3 = vpop.permute.xlu0 %1033 }
 0x152   : > { %v1045_v59 = vadd.f32 %v1034_v3, %v1019_v8  ;;  %v1336_v3 = vmul.f32 %v3461_v4, %v3170_v43 }
 0x153   : > { %v1010_v56 = vpop.permute.xlu1 %1009  ;;  %1241 = vrot.lane.b32.xlu0 %v1231_v16, %s3871_s24 }
 0x154   : > { %v3431_v29 = vadd.f32 %v1051_v27, %v1045_v59 }
 0x155   : > { %1217 = vrot.lane.b32.xlu1 %v3241_v18, %s2774_s27  ;;  %v1292_v44 = vpop.permute.xlu0 %1291  ;;  %v1020_v18 = vadd.f32 %v1010_v56, %v990_v33  ;;  %s2314_s27 = sld [smem:[#allocation3 + $0xf]] }
 0x156   : > { %v1303_v10 = vadd.f32 %v1292_v44, %v1273_v2 }
 0x157   : > { %v867_v32 = vpop.permute.xlu1 %866 }
 0x158   : > { %v877_v5 = vadd.f32 %v867_v32, %v847_v63 }
 0x159   : > { %1385 = vrot.lane.b32.xlu1 %v1374_v0, %s3871_s24  ;;  %v891_v37 = vpop.permute.xlu0 %890 }
 0x15a   : > { %v902_v39 = vadd.f32 %v891_v37, %v876_v34 }
 0x15b   : > { %v1036_v42 = vpop.permute.xlu1 %1035  ;;  %v3471_v15 = vstv %s2314_s27  ;;  %s2368_s27 = sshll.u32 %s2853_s13, 9 }
 0x15c   : > { %v1046_v49 = vadd.f32 %v1036_v42, %v1020_v18  ;;  %v3452_v51 = vadd.f32 %v908_v40, %v902_v39  ;;  %v1193_v62 = vmul.f32 %v3471_v15, %v3124_v24  ;;  %v1194_v44 = vmul.f32 %v3471_v15, %v3170_v43 }
 0x15d   : > { %1243 = vrot.lane.b32.xlu1 %v1232_v45, %s3871_s24  ;;  %v1150_v54 = vpop.permute.xlu0 %1149  ;;  %s2310_s24 = sld [smem:[#allocation6 + $0x1]] }
 0x15e   : > { %v1056_v55 = vadd.f32 %v1052_v50, %v1046_v49  ;;  %v1161_v21 = vadd.f32 %v1150_v54, %v1131_v6 }
 0x15f   : > { %v1294_v58 = vpop.permute.xlu1 %1293 }
 0x160   : > { %v1304_v61 = vadd.f32 %v1294_v58, %v1274_v19 }
 0x161   : > { %v1318_v1 = vpop.permute.xlu0 %1317 }
 0x162   : > { %v1329_v11 = vadd.f32 %v1318_v1, %v1303_v10 }
 0x163   : > { %v893_v20 = vpop.permute.xlu1 %892  ;;  %v3490_v40 = vstv %s2310_s24  ;;  %s402_s24 = scalar_lea.vmem %s3846_s2, %s3874_s16 }
 0x164   : > { %v903_v13 = vadd.f32 %v893_v20, %v877_v5  ;;  %v3469_v22 = vadd.f32 %v1335_v47, %v1329_v11 }
 0x165   : > { %v1176_v23 = vpop.permute.xlu0 %1175 }
 0x166   : > { %v1187_v52 = vadd.f32 %v1176_v23, %v1161_v21  ;;  %v913_v25 = vadd.f32 %v909_v48, %v903_v13  ;;  %v3503_v13 = vstv %s968_s0  ;;  %s2776_s0 = smov 20  }
 0x167   : > { %v1152_v17 = vpop.permute.xlu1 %1151 }
 0x168   : > { %v3477_v35 = vadd.f32 %v1193_v62, %v1187_v52  ;;  %v1162_v59 = vadd.f32 %v1152_v17, %v1132_v14  ;;  %v1053_v52 = vmul.f32 %v3424_v26, %v3140_v31  ;;  %v992_v14 = vmul.f32 %v3410_v53, %v3191_v57 }
 0x169   : > { %v1070_v36 = vpop.permute.xlu0 %1069 }
 0x16a   : > { %v1081_v37 = vadd.f32 %v1070_v36, %v3431_v29  ;;  %v1884_v29 = vld [vmem:[%s402_s24 + $0x8] sm:$0xff] }
 0x16b   : > { %v1320_v12 = vpop.permute.xlu1 %1319  ;;  %1893 = vrot.lane.b32.xlu1 %v1884_v29, %s2776_s0 }
 0x16c   : > { %v1330_v8 = vadd.f32 %v1320_v12, %v1304_v61 }
 0x16d   : > { %v927_v16 = vpop.permute.xlu0 %926 }
 0x16e   : > { %v3483_v27 = vadd.f32 %v1336_v3, %v1330_v8  ;;  %v938_v5 = vadd.f32 %v927_v16, %v3452_v51 }
 0x16f   : > { %v1178_v24 = vpop.permute.xlu1 %1177 }
 0x170   : > { %v1188_v56 = vadd.f32 %v1178_v24, %v1162_v59  ;;  %v848_v59 = vmul.f32 %v3428_v28, %v3163_v41 }
 0x171   : > { %v1012_v30 = vpop.permute.xlu0 %1011 }
 0x172   : > { %v3487_v32 = vadd.f32 %v1194_v44, %v1188_v56 }
 0x173   : > { %v1072_v0 = vpop.permute.xlu1 %1071 }
 0x174   : > { %v1082_v45 = vadd.f32 %v1072_v0, %v1056_v55  ;;  %v991_v55 = vmul.f32 %v3410_v53, %v3163_v41  ;;  %v1054_v0 = vmul.f32 %v3424_v26, %v3212_v7  ;;  %v849_v26 = vmul.f32 %v3428_v28, %v3191_v57 }
 0x175   : > { %v1096_v33 = vpop.permute.xlu0 %1095  ;;  %v1133_v28 = vmul.f32 %v3457_v60, %v3163_v41 }
 0x176   : > { %v1107_v39 = vadd.f32 %v1096_v33, %v1081_v37  ;;  %v1021_v47 = vadd.f32 %v1012_v30, %v991_v55 }
 0x177   : > { %v929_v9 = vpop.permute.xlu1 %928 }
 0x178   : > { %v1113_v50 = vadd.f32 %v3490_v40, %v1107_v39  ;;  %v939_v48 = vadd.f32 %v929_v9, %v913_v25 }
 0x179   : > { %v1354_v34 = vpop.permute.xlu0 %1353 }
 0x17a   : > { %v1117_v63 = vmax.f32 %v1113_v50, 0.0  ;;  %v1365_v53 = vadd.f32 %v1354_v34, %v3469_v22 }
 0x17b   : > { %v1014_v18 = vpop.permute.xlu1 %1013 }
 0x17c   : > { %v1022_v16 = vadd.f32 %v1014_v18, %v992_v14  ;;  %v910_v18 = vmul.f32 %v3442_v38, %v3140_v31 }
 0x17d   : > { %v869_v42 = vpop.permute.xlu0 %868 }
 0x17e   : > { %v878_v44 = vadd.f32 %v869_v42, %v848_v59  ;;  %v3526_v42 = vstv %s2324_s23 }
 0x17f   : > { %v1098_v49 = vpop.permute.xlu1 %1097 }
 0x180   : > { %v1108_v43 = vadd.f32 %v1098_v49, %v1082_v45 }
 0x181   : > { %v953_v54 = vpop.permute.xlu0 %952 }
 0x182   : > { %v1114_v2 = vadd.f32 %v3490_v40, %v1108_v43  ;;  %v964_v20 = vadd.f32 %v953_v54, %v938_v5 }
 0x183   : > { %v1356_v58 = vpop.permute.xlu1 %1355 }
 0x184   : > { %v1118_v10 = vmax.f32 %v1114_v2, 0.0  ;;  %v970_v51 = vadd.f32 %v3503_v13, %v964_v20  ;;  %v1366_v43 = vadd.f32 %v1356_v58, %v3483_v27 }
 0x185   : > { %v1212_v1 = vpop.permute.xlu0 %1211 }
 0x186   : > { %v2370_v6 = vpack.c.bf16 %v1118_v10, %v1117_v63  ;;  %v974_v8 = vmax.f32 %v970_v51, 0.0  ;;  %v1275_v10 = vmul.f32 %v3446_v46, %v3163_v41 }
 0x187   : > { %v871_v11 = vpop.permute.xlu1 %870 }
 0x188   : > { %2371 = vmatprep.mubr.msk.bf16.mxu0 %vm3494_vm10, %v2370_v6  ;;  %v879_v63 = vadd.f32 %v871_v11, %v849_v26  ;;  %v911_v6 = vmul.f32 %v3442_v38, %v3212_v7  ;;  %v1337_v11 = vmul.f32 %v3461_v4, %v3140_v31 }
 0x189   : > { %v1038_v21 = vpop.permute.xlu0 %1037 }
 0x18a   : > { %v1047_v23 = vadd.f32 %v1038_v21, %v1021_v47 }
 0x18b   : > { %v955_v62 = vpop.permute.xlu1 %954 }
 0x18c   : > { %v965_v17 = vadd.f32 %v955_v62, %v939_v48  ;;  %v3508_v19 = vadd.f32 %v1053_v52, %v1047_v23  ;;  %v1223_v48 = vadd.f32 %v1212_v1, %v3477_v35  ;;  %v1276_v1 = vmul.f32 %v3446_v46, %v3191_v57 }
 0x18d   : > { %v1296_v36 = vpop.permute.xlu0 %1295 }
 0x18e   : > { %v971_v61 = vadd.f32 %v3503_v13, %v965_v17  ;;  %v1305_v27 = vadd.f32 %v1296_v36, %v1275_v10  ;;  %v3544_v36 = vstv %s2317_s25  ;;  %s2779_s25 = smov [#allocation8]  }
 0x18f   : > { %v1214_v12 = vpop.permute.xlu1 %1213  ;;  %s2702_s17 = sshll.u32 %s2779_s25, 4  ;;  %s2703_s17 = int_to_ptr.vmem [resolvable:$false] %s2702_s17 }
 0x190   : > { %v975_v3 = vmax.f32 %v971_v61, 0.0  ;;  %v1224_v41 = vadd.f32 %v1214_v12, %v3487_v32 }
 0x191   : > { %v1380_v25 = vpop.permute.xlu0 %1379 }
 0x192   : > { %v2373_v24 = vpack.c.bf16 %v975_v3, %v974_v8  ;;  %v1391_v45 = vadd.f32 %v1380_v25, %v1365_v53  ;;  %v1195_v3 = vmul.f32 %v3471_v15, %v3140_v31  ;;  %v1338_v31 = vmul.f32 %v3461_v4, %v3212_v7 }
 0x193   : > { %v1040_v56 = vpop.permute.xlu1 %1039 }
 0x194   : > { %v1048_v30 = vadd.f32 %v1040_v56, %v1022_v16  ;;  %2374 = vmatmul.mubr.msk.bf16.vlgmr.msra.gmra.mrb[0].mxu0 %vm3494_vm10, %v2373_v24  ;;  %v1397_v22 = vadd.f32 %v3526_v42, %v1391_v45 }
 0x195   : > { %v895_v33 = vpop.permute.xlu0 %894 }
 0x196   : > { %v904_v9 = vadd.f32 %v895_v33, %v878_v44  ;;  %v3520_v37 = vadd.f32 %v1054_v0, %v1048_v30  ;;  %v1401_v58 = vmax.f32 %v1397_v22, 0.0  ;;  %v1134_v30 = vmul.f32 %v3457_v60, %v3191_v57 }
 0x197   : > { %v1298_v39 = vpop.permute.xlu1 %1297 }
 0x198   : > { %v3524_v49 = vadd.f32 %v910_v18, %v904_v9  ;;  %v1306_v56 = vadd.f32 %v1298_v39, %v1276_v1  ;;  %v1196_v39 = vmul.f32 %v3471_v15, %v3212_v7 }
 0x199   : > { %v1154_v50 = vpop.permute.xlu0 %1153 }
 0x19a   : > { %v1163_v17 = vadd.f32 %v1154_v50, %v1133_v28 }
 0x19b   : > { %v1382_v54 = vpop.permute.xlu1 %1381 }
 0x19c   : > { %v1392_v34 = vadd.f32 %v1382_v54, %v1366_v43 }
 0x19d   : > { %v1238_v2 = vpop.permute.xlu0 %1237 }
 0x19e   : > { %v1398_v5 = vadd.f32 %v3526_v42, %v1392_v34  ;;  %v1249_v61 = vadd.f32 %v1238_v2, %v1223_v48 }
 0x19f   : > { %v897_v55 = vpop.permute.xlu1 %896 }
 0x1a0   : > { %v1402_v47 = vmax.f32 %v1398_v5, 0.0  ;;  %v905_v20 = vadd.f32 %v897_v55, %v879_v63  ;;  %v1255_v25 = vadd.f32 %v3544_v36, %v1249_v61 }
 0x1a1   : > { %v1322_v21 = vpop.permute.xlu0 %1321 }
 0x1a2   : > { %v2382_v23 = vpack.c.bf16 %v1402_v47, %v1401_v58  ;;  %v1331_v52 = vadd.f32 %v1322_v21, %v1305_v27  ;;  %v915_v62 = vadd.f32 %v911_v6, %v905_v20  ;;  %v1259_v12 = vmax.f32 %v1255_v25, 0.0 }
 0x1a3   : > { %v1156_v51 = vpop.permute.xlu1 %1155 }
 0x1a4   : > { %2383 = vmatprep.mubr.msk.bf16.mxu1 %vm3494_vm10, %v2382_v23  ;;  %v1341_v38 = vadd.f32 %v1337_v11, %v1331_v52  ;;  %v1164_v46 = vadd.f32 %v1156_v51, %v1134_v30 }
 0x1a5   : > { %v1180_v14 = vpop.permute.xlu0 %1179 }
 0x1a6   : > { %v1189_v8 = vadd.f32 %v1180_v14, %v1163_v17 }
 0x1a7   : > { %v1240_v35 = vpop.permute.xlu1 %1239 }
 0x1a8   : > { %v1250_v16 = vadd.f32 %v1240_v35, %v1224_v41  ;;  %v1199_v59 = vadd.f32 %v1195_v3, %v1189_v8 }
 0x1a9   : > { %v1074_v24 = vpop.permute.xlu0 %1073 }
 0x1aa   : > { %v1256_v44 = vadd.f32 %v3544_v36, %v1250_v16  ;;  %v1083_v26 = vadd.f32 %v1074_v24, %v3508_v19 }
 0x1ab   : > { %v1324_v32 = vpop.permute.xlu1 %1323 }
 0x1ac   : > { %v1260_v0 = vmax.f32 %v1256_v44, 0.0  ;;  %v1332_v33 = vadd.f32 %v1324_v32, %v1306_v56 }
 0x1ad   : > { %v931_v53 = vpop.permute.xlu0 %930 }
 0x1ae   : > { %v2385_v9 = vpack.c.bf16 %v1260_v0, %v1259_v12  ;;  %v1342_v18 = vadd.f32 %v1338_v31, %v1332_v33  ;;  %v940_v6 = vadd.f32 %v931_v53, %v3524_v49  ;;  %v1883_v0 = vld [vmem:[%s402_s24] sm:$0xff]  ;;  %v1886_v33 = vld [vmem:[%s402_s24 + $0x18] sm:$0xff]  ;;  %v1885_v31 = vld [vmem:[%s402_s24 + $0x10] sm:$0xff] }
 0x1af   : > { %v1182_v45 = vpop.permute.xlu1 %1181  ;;  %1891 = vrot.lane.b32.xlu0 %v1883_v0, %s2776_s0  ;;  %1897 = vrot.lane.b32.xlu1 %v1886_v33, %s2776_s0  ;;  %v2636_v53 = vld [vmem:[%s2928_s14] sm:$0x3] }
 0x1b0   : > { %v1190_v50 = vadd.f32 %v1182_v45, %v1164_v46  ;;  %2386 = vmatmul.mubr.msk.bf16.vlgmr.msra.gmra.mrb[0].mxu1 %vm3494_vm10, %v2385_v9  ;;  %v439_v46 = vsel %vm438_vm11, %v2636_v53, 0.0  ;;  %v2637_v9 = vld [vmem:[%s2928_s14 + $0x10] sm:$0x3]  ;;  %v2638_v45 = vld [vmem:[%s2928_s14 + $0x2] sm:$0x3] }
 0x1b1   : > { %v1100_v57 = vpop.permute.xlu0 %1099 }
 0x1b2   : > { %v1200_v60 = vadd.f32 %v1196_v39, %v1190_v50  ;;  %v1109_v4 = vadd.f32 %v1100_v57, %v1083_v26  ;;  %v442_v50 = vsel %vm438_vm11, %v2638_v45, 0.0  ;;  %v2639_v39 = vld [vmem:[%s2928_s14 + $0x12] sm:$0x3] }
 0x1b3   : > { %v1076_v43 = vpop.permute.xlu1 %1075  ;;  %1895 = vrot.lane.b32.xlu0 %v1885_v31, %s2776_s0  ;;  %v466_v57 = vsel %vm438_vm11, %v2639_v39, 0.0  ;;  %v2659_v31 = vld [vmem:[%s2928_s14 + $0x3a] sm:$0x3]  ;;  %v2661_v39 = vld [vmem:[%s2928_s14 + $0x1c] sm:$0x3]  ;;  %s3798_s0 = scalar_lea.hbm %s3853_s9, %s2368_s27 }
 0x1b4   : > { %v1084_v2 = vadd.f32 %v1076_v43, %v3520_v37  ;;  %v1115_v10 = vadd.f32 %v3490_v40, %v1109_v4  ;;  %v526_v53 = vsel %vm438_vm11, %v2659_v31, 0.0 }
 0x1b5   : > { %v1358_v54 = vpop.permute.xlu0 %1357 }
 0x1b6   : > { %v1119_v27 = vmax.f32 %v1115_v10, 0.0  ;;  %v1367_v48 = vadd.f32 %v1358_v54, %v1341_v38  ;;  %v2641_v54 = vld [vmem:[%s2928_s14 + $0x22] sm:$0x3] }
 0x1b7   : > { %v933_v22 = vpop.permute.xlu1 %932  ;;  %v490_v26 = vsel %vm438_vm11, %v2641_v54, 0.0  ;;  %v2663_v54 = vld [vmem:[%s2928_s14 + $0xe] sm:$0x3] }
 0x1b8   : > { %v941_v20 = vadd.f32 %v933_v22, %v915_v62  ;;  %v2642_v22 = vld [vmem:[%s2928_s14 + $0x30] sm:$0x3] }
 0x1b9   : > { %v957_v34 = vpop.permute.xlu0 %956  ;;  %v511_v4 = vsel %vm438_vm11, %v2642_v22, 0.0 }
 0x1ba   : > { %v966_v47 = vadd.f32 %v957_v34, %v940_v6 }
 0x1bb   : > { %v1102_v63 = vpop.permute.xlu1 %1101 }
 0x1bc   : > { %v1110_v5 = vadd.f32 %v1102_v63, %v1084_v2  ;;  %v972_v11 = vadd.f32 %v3503_v13, %v966_v47 }
 0x1bd   : > { %v1216_v55 = vpop.permute.xlu0 %1215 }
 0x1be   : > { %v1116_v7 = vadd.f32 %v3490_v40, %v1110_v5  ;;  %v976_v52 = vmax.f32 %v972_v11, 0.0  ;;  %v1225_v62 = vadd.f32 %v1216_v55, %v1199_v59  ;;  %v2643_v5 = vld [vmem:[%s2928_s14 + $0x32] sm:$0x3]  ;;  %v2648_v11 = vld [vmem:[%s2928_s14 + $0x6] sm:$0x3] }
 0x1bf   : > { %v1360_v15 = vpop.permute.xlu1 %1359  ;;  %v514_v55 = vsel %vm438_vm11, %v2643_v5, 0.0 }
 0x1c0   : > { %v1120_v58 = vmax.f32 %v1116_v7, 0.0  ;;  %v1368_v61 = vadd.f32 %v1360_v15, %v1342_v18  ;;  %v463_v18 = vsel %vm438_vm11, %v2637_v9, 0.0  ;;  %v2644_v7 = vld [vmem:[%s2928_s14 + $0x4] sm:$0x3] }
 0x1c1   : > { %v1384_v21 = vpop.permute.xlu0 %1383  ;;  %v445_v15 = vsel %vm438_vm11, %v2644_v7, 0.0 }
 0x1c2   : > { %v2376_v19 = vpack.c.bf16 %v1120_v58, %v1119_v27  ;;  %v1393_v51 = vadd.f32 %v1384_v21, %v1367_v48  ;;  %v2645_v58 = vld [vmem:[%s2928_s14 + $0x14] sm:$0x3]  ;;  %v2649_v48 = vld [vmem:[%s2928_s14 + $0x16] sm:$0x3] }
 0x1c3   : > { %v959_v28 = vpop.permute.xlu1 %958  ;;  %v469_v47 = vsel %vm438_vm11, %v2645_v58, 0.0 }
 0x1c4   : > { %v967_v37 = vadd.f32 %v959_v28, %v941_v20  ;;  %2377 = vmatprep.mubr.msk.bf16.mxu0 %vm3494_vm10, %v2376_v19  ;;  %v1399_v8 = vadd.f32 %v3526_v42, %v1393_v51  ;;  %v2646_v20 = vld [vmem:[%s2928_s14 + $0x24] sm:$0x3]  ;;  %v2647_v28 = vld [vmem:[%s2928_s14 + $0x34] sm:$0x3] }
 0x1c5   : > { %v1242_v17 = vpop.permute.xlu0 %1241  ;;  %v493_v19 = vsel %vm438_vm11, %v2646_v20, 0.0  ;;  %v517_v21 = vsel %vm438_vm11, %v2647_v28, 0.0 }
 0x1c6   : > { %v973_v23 = vadd.f32 %v3503_v13, %v967_v37  ;;  %v1251_v35 = vadd.f32 %v1242_v17, %v1225_v62  ;;  %v1403_v25 = vmax.f32 %v1399_v8, 0.0  ;;  %v448_v37 = vsel %vm438_vm11, %v2648_v11, 0.0  ;;  %v2652_v17 = vld [vmem:[%s2928_s14 + $0x8] sm:$0x3] }
 0x1c7   : > { %v1218_v49 = vpop.permute.xlu1 %1217 }
 0x1c8   : > { %v977_v40 = vmax.f32 %v973_v23, 0.0  ;;  %v1226_v1 = vadd.f32 %v1218_v49, %v1200_v60  ;;  %v1257_v24 = vadd.f32 %v3544_v36, %v1251_v35  ;;  %v2640_v60 = vld [vmem:[%s2928_s14 + $0x20] sm:$0x3]  ;;  %v472_v23 = vsel %vm438_vm11, %v2649_v48, 0.0  ;;  %v2650_v49 = vld [vmem:[%s2928_s14 + $0x26] sm:$0x3] }
 0x1c9   : > { %v487_v43 = vsel %vm438_vm11, %v2640_v60, 0.0  ;;  %v2662_v60 = vld [vmem:[%s2928_s14 + $0x2c] sm:$0x3] }
 0x1ca   : > { %v2379_v14 = vpack.c.bf16 %v977_v40, %v976_v52  ;;  %v1261_v30 = vmax.f32 %v1257_v24, 0.0  ;;  %v496_v52 = vsel %vm438_vm11, %v2650_v49, 0.0  ;;  %v2651_v40 = vld [vmem:[%s2928_s14 + $0x36] sm:$0x3] }
 0x1cb   : > { %v1386_v41 = vpop.permute.xlu1 %1385  ;;  %v520_v51 = vsel %vm438_vm11, %v2651_v40, 0.0 }
 0x1cc   : > { %v1394_v3 = vadd.f32 %v1386_v41, %v1368_v61  ;;  %2380 = vmatmul.mubr.msk.bf16.gmra.mrb[4].mxu0 %vm3494_vm10, %v2379_v14  ;;  %v451_v61 = vsel %vm438_vm11, %v2652_v17, 0.0  ;;  %v2653_v14 = vld [vmem:[%s2928_s14 + $0x18] sm:$0x3]  ;;  %v2654_v41 = vld [vmem:[%s2928_s14 + $0x28] sm:$0x3] }
 0x1cd   : > { %v475_v62 = vsel %vm438_vm11, %v2653_v14, 0.0  ;;  %v499_v8 = vsel %vm438_vm11, %v2654_v41, 0.0 }
 0x1ce   : > { %v1400_v38 = vadd.f32 %v3526_v42, %v1394_v3  ;;  %v2562_v42 = vld [vmem:[%s3851_s7] sm:$0xff]   ;;  %v2655_v3 = vld [vmem:[%s2928_s14 + $0x38] sm:$0x3] }
 0x1cf   : > { %v1244_v13 = vpop.permute.xlu1 %1243  ;;  %2453 = vmatprep.subr.bf16.mxu0 %v2562_v42  ;;  %v523_v35 = vsel %vm438_vm11, %v2655_v3, 0.0 }
 0x1d0   : > { %v1404_v16 = vmax.f32 %v1400_v38, 0.0  ;;  %v1252_v56 = vadd.f32 %v1244_v13, %v1226_v1  ;;  %2454 = vmatpush3.bf16.msra.mxu0 %v2562_v42  ;;  %v2325_v1 = vld [vmem:[%s3850_s6] ss:$0 sm:$0xff]  ;;  %v2656_v38 = vld [vmem:[%s2928_s14 + $0xa] sm:$0x3] }
 0x1d1   : > { %v454_v13 = vsel %vm438_vm11, %v2656_v38, 0.0 }
 0x1d2   : > { %v2388_v44 = vpack.c.bf16 %v1404_v16, %v1403_v25  ;;  %v1258_v59 = vadd.f32 %v3544_v36, %v1252_v56  ;;  %v2563_v36 = vld [vmem:[%s3851_s7 + $0x8] sm:$0xff]   ;;  %440 = vadd.xlane.f32.xlu0 %v439_v46 }
 0x1d3   : > { %2455 = vmatprep.subr.bf16.mxu0 %v2563_v36  ;;  %443 = vadd.xlane.f32.xlu1 %v442_v50  ;;  %v2660_v46 = vld [vmem:[%s2928_s14 + $0xc] sm:$0x3] }
 0x1d4   : > { %v1262_v32 = vmax.f32 %v1258_v59, 0.0  ;;  %2389 = vmatprep.mubr.msk.bf16.mxu1 %vm3494_vm10, %v2388_v44  ;;  %2456 = vmatpush3.bf16.msra.mxu0 %v2563_v36  ;;  %v2657_v59 = vld [vmem:[%s2928_s14 + $0x1a] sm:$0x3]  ;;  %v457_v9 = vsel %vm438_vm11, %v2660_v46, 0.0 }
 0x1d6   : > { %v2391_v12 = vpack.c.bf16 %v1262_v32, %v1261_v30  ;;  %464 = vadd.xlane.f32.xlu0 %v463_v18  ;;  %v478_v30 = vsel %vm438_vm11, %v2657_v59, 0.0 }
 0x1d7   : > { %488 = vadd.xlane.f32.xlu1 %v487_v43  ;;  %v505_v43 = vsel %vm438_vm11, %v2662_v60, 0.0 }
 0x1d8   : > { %2392 = vmatmul.mubr.msk.bf16.gmra.mrb[4].mxu1 %vm3494_vm10, %v2391_v12  ;;  %v2658_v12 = vld [vmem:[%s2928_s14 + $0x2a] sm:$0x3] }
 0x1d9   : > { %v502_v42 = vsel %vm438_vm11, %v2658_v12, 0.0 }
 0x1da   : > { %467 = vadd.xlane.f32.xlu0 %v466_v57  ;;  %v481_v57 = vsel %vm438_vm11, %v2661_v39, 0.0 }
 0x1db   : > { %512 = vadd.xlane.f32.xlu1 %v511_v4 }
 0x1dd   : > { %v3654_v48 = vpop.permute.xlu1 %1893 }
 0x1de   : > { %491 = vadd.xlane.f32.xlu0 %v490_v26  ;;  %v460_v26 = vsel %vm438_vm11, %v2663_v54, 0.0 }
 0x1df   : > { %446 = vadd.xlane.f32.xlu1 %v445_v15 }
 0x1e2   : > { %515 = vadd.xlane.f32.xlu0 %v514_v55 }
 0x1e3   : > { %494 = vadd.xlane.f32.xlu1 %v493_v19 }
 0x1e6   : > { %470 = vadd.xlane.f32.xlu0 %v469_v47 }
 0x1e7   : > { %449 = vadd.xlane.f32.xlu1 %v448_v37 }
 0x1ea   : > { %518 = vadd.xlane.f32.xlu0 %v517_v21 }
 0x1eb   : > { %497 = vadd.xlane.f32.xlu1 %v496_v52  ;;  %v1975_v52 = vlaneseq }
 0x1ed   : > { %v1976_v17 = vand.u32 127, %v1975_v52 }
 0x1ee   : > { %473 = vadd.xlane.f32.xlu0 %v472_v23 }
 0x1ef   : > { %452 = vadd.xlane.f32.xlu1 %v451_v61  ;;  %v1979_v61 = vshrl.u32 %v1975_v52, 7  ;;  %v1977_v14 = vadd.s32 4294967236, %v1976_v17 }
 0x1f2   : > { %521 = vadd.xlane.f32.xlu0 %v520_v51 }
 0x1f3   : > { %500 = vadd.xlane.f32.xlu1 %v499_v8  ;;  %v3660_v8 = vsub.s32 %v1977_v14, %v1979_v61 }
 0x1f6   : > { %476 = vadd.xlane.f32.xlu0 %v475_v62 }
 0x1f7   : > { %455 = vadd.xlane.f32.xlu1 %v454_v13 }
 0x1fa   : > { %524 = vadd.xlane.f32.xlu0 %v523_v35 }
 0x1fb   : > { %503 = vadd.xlane.f32.xlu1 %v502_v42 }
 0x1fe   : > { %479 = vadd.xlane.f32.xlu0 %v478_v30 }
 0x1ff   : > { %458 = vadd.xlane.f32.xlu1 %v457_v9 }
 0x202   : > { %527 = vadd.xlane.f32.xlu0 %v526_v53 }
 0x203   : > { %506 = vadd.xlane.f32.xlu1 %v505_v43 }
 0x206   : > { %482 = vadd.xlane.f32.xlu0 %v481_v57 }
 0x207   : > { %461 = vadd.xlane.f32.xlu1 %v460_v26 }
 0x221   : > { %v3652_v37 = vpop.permute.xlu0 %1891  ;;  %v3658_v49 = vpop.permute.xlu1 %1897 }
 0x225   : > { %v3656_v23 = vpop.permute.xlu0 %1895 }
 0x25f   : > { %v441_v40 = vpop.xlane.xlu0 %440 }
 0x260   : > { %v444_v51 = vpop.xlane.xlu1 %443  ;;  %v1981_v35 = vrot.slane %v441_v40, %v3660_v8 }
 0x261   : > { %v1985_v3 = vrot.slane %v444_v51, %v3660_v8 }
 0x263   : > { %v465_v62 = vpop.xlane.xlu0 %464 }
 0x264   : > { %v489_v41 = vpop.xlane.xlu1 %488 }
 0x267   : > { %v2409_v34 = vpop.f32.mrb[0].mxu0  ;;  %v468_v38 = vpop.xlane.xlu0 %467 }
 0x268   : > { %v2410_v2 = vpop.f32.mrb[1].mxu0  ;;  %v513_v13 = vpop.xlane.xlu1 %512 }
 0x269   : > { %v2411_v63 = vadd.f32 %v2410_v2, %v2409_v34  ;;  %v2412_v10 = vpop.f32.mrb[2].mxu0  ;;  %v2077_v12 = vrot.slane %v513_v13, %v3660_v8 }
 0x26a   : > { %v2413_v6 = vpop.f32.mrb[3].mxu0 }
 0x26b   : > { %v2414_v27 = vadd.f32 %v2413_v6, %v2412_v10  ;;  %v1719_v24 = vadd.f32 %v2411_v63, %v2325_v1 }
 0x26c   : > { %v447_v59 = vpop.xlane.xlu1 %446 }
 0x26d   : > { %v1722_v36 = vadd.f32 %v2414_v27, %v2325_v1 }
 0x283   : > { %v2437_v25 = vpop.f32.mrb[0].mxu1 }
 0x284   : > { %v2438_v16 = vpop.f32.mrb[1].mxu1 }
 0x285   : > { %v2439_v56 = vadd.f32 %v2438_v16, %v2437_v25  ;;  %v2440_v44 = vpop.f32.mrb[2].mxu1  ;;  %v2017_v25 = vrot.slane %v468_v38, %v3660_v8  ;;  %v2106_v16 = vsel %vm668_vm0, %v1985_v3, %v1981_v35 }
 0x286   : > { %v2441_v32 = vpop.f32.mrb[3].mxu1 }
 0x287   : > { %v1768_v29 = vadd.f32 %v2439_v56, %v1719_v24  ;;  %v2442_v0 = vadd.f32 %v2441_v32, %v2440_v44  ;;  %v2045_v24 = vrot.slane %v489_v41, %v3660_v8  ;;  %v492_v44 = vpop.xlane.xlu0 %491  ;;  %v1989_v32 = vrot.slane %v447_v59, %v3660_v8 }
 0x288   : > { %v2049_v30 = vrot.slane %v492_v44, %v3660_v8 }
 0x289   : > { %v1771_v33 = vadd.f32 %v2442_v0, %v1722_v36  ;;  %v1782_v18 = vmax.f32 %v1768_v29, 0.0  ;;  %v2107_v36 = vsel %vm671_vm1, %v1989_v32, %v2106_v16  ;;  %v495_v0 = vpop.xlane.xlu1 %494 }
 0x28a   : > { %v2120_v42 = vsel %vm668_vm0, %v2049_v30, %v2045_v24  ;;  %v2053_v31 = vrot.slane %v495_v0, %v3660_v8  ;;  %v2358_v30 = vld [vmem:[%s3852_s8] ss:$0 sm:$0xff] }
 0x28b   : > { %v1783_v45 = vmax.f32 %v1771_v33, 0.0  ;;  %v516_v29 = vpop.xlane.xlu0 %515 }
 0x28c   : > { %v2081_v33 = vrot.slane %v516_v29, %v3660_v8  ;;  %v2121_v46 = vsel %vm671_vm1, %v2053_v31, %v2120_v42 }
 0x28d   : > { %v1786_v50 = vpack.c.bf16 %v1783_v45, %v1782_v18  ;;  %v450_v9 = vpop.xlane.xlu1 %449 }
 0x28e   : > { %v2127_v53 = vsel %vm668_vm0, %v2081_v33, %v2077_v12  ;;  %v1993_v18 = vrot.slane %v450_v9, %v3660_v8 }
 0x28f   : > { %2457 = vmatprep.mubr.msk.bf16.mxu0 %vm1811_vm12, %v1786_v50  ;;  %v471_v50 = vpop.xlane.xlu0 %470 }
 0x290   : > { %v2108_v45 = vsel %vm674_vm2, %v1993_v18, %v2107_v36  ;;  %v2021_v57 = vrot.slane %v471_v50, %v3660_v8 }
 0x291   : > { %v498_v39 = vpop.xlane.xlu1 %497 }
 0x292   : > { %v2057_v60 = vrot.slane %v498_v39, %v3660_v8 }
 0x293   : > { %v519_v26 = vpop.xlane.xlu0 %518 }
 0x294   : > { %v2122_v54 = vsel %vm674_vm2, %v2057_v60, %v2121_v46 }
 0x29f   : > { %v2415_v22 = vpop.f32.mrb[4].mxu0 }
 0x2a0   : > { %v2416_v4 = vpop.f32.mrb[5].mxu0 }
 0x2a1   : > { %v2417_v34 = vadd.f32 %v2416_v4, %v2415_v22  ;;  %v2418_v2 = vpop.f32.mrb[6].mxu0  ;;  %v453_v22 = vpop.xlane.xlu1 %452  ;;  %v2085_v4 = vrot.slane %v519_v26, %v3660_v8 }
 0x2a2   : > { %v2419_v63 = vpop.f32.mrb[7].mxu0 }
 0x2a3   : > { %v2420_v10 = vadd.f32 %v2419_v63, %v2418_v2  ;;  %v1727_v6 = vadd.f32 %v2417_v34, %v2325_v1  ;;  %v1997_v34 = vrot.slane %v453_v22, %v3660_v8  ;;  %v2128_v2 = vsel %vm671_vm1, %v2085_v4, %v2127_v53 }
 0x2a5   : > { %v1730_v58 = vadd.f32 %v2420_v10, %v2325_v1  ;;  %v2013_v1 = vrot.slane %v465_v62, %v3660_v8  ;;  %v2109_v63 = vsel %vm677_vm3, %v1997_v34, %v2108_v45  ;;  %v474_v10 = vpop.xlane.xlu0 %473 }
 0x2a7   : > { %v2113_v56 = vsel %vm668_vm0, %v2017_v25, %v2013_v1  ;;  %vm2153_vm0 = vcmask 506880  }
 0x2a8   : > { %v2114_v43 = vsel %vm671_vm1, %v2021_v57, %v2113_v56 }
 0x2ab   : > { %v2443_v5 = vpop.f32.mrb[4].mxu1 }
 0x2ac   : > { %v2444_v55 = vpop.f32.mrb[5].mxu1 }
 0x2ad   : > { %v2445_v7 = vadd.f32 %v2444_v55, %v2443_v5  ;;  %v2446_v15 = vpop.f32.mrb[6].mxu1  ;;  %v501_v5 = vpop.xlane.xlu1 %500  ;;  %v2025_v55 = vrot.slane %v474_v10, %v3660_v8  ;;  %v2665_v10 = vld [vmem:[%s2928_s14 + $0x1e] sm:$0x3] }
 0x2ae   : > { %v2447_v27 = vpop.f32.mrb[7].mxu1 }
 0x2af   : > { %v1776_v47 = vadd.f32 %v2445_v7, %v1727_v6  ;;  %v2448_v20 = vadd.f32 %v2447_v27, %v2446_v15  ;;  %v2061_v6 = vrot.slane %v501_v5, %v3660_v8  ;;  %v2115_v7 = vsel %vm674_vm2, %v2025_v55, %v2114_v43  ;;  %v522_v27 = vpop.xlane.xlu0 %521 }
 0x2b0   : > { %v484_v5 = vsel %vm438_vm11, %v2665_v10, 0.0 }
 0x2b1   : > { %v1779_v19 = vadd.f32 %v2448_v20, %v1730_v58  ;;  %v1784_v28 = vmax.f32 %v1776_v47, 0.0  ;;  %v2123_v15 = vsel %vm677_vm3, %v2061_v6, %v2122_v54  ;;  %v456_v58 = vpop.xlane.xlu1 %455  ;;  %v2089_v47 = vrot.slane %v522_v27, %v3660_v8  ;;  %v2667_v6 = vld [vmem:[%s2928_s14 + $0x3e] sm:$0x3] }
 0x2b2   : > { %v2001_v20 = vrot.slane %v456_v58, %v3660_v8 }
 0x2b3   : > { %v1785_v21 = vmax.f32 %v1779_v19, 0.0  ;;  %v2129_v19 = vsel %vm674_vm2, %v2089_v47, %v2128_v2 }
 0x2b5   : > { %v1787_v11 = vpack.c.bf16 %v1785_v21, %v1784_v28  ;;  %v2110_v28 = vsel %vm680_vm4, %v2001_v20, %v2109_v63  ;;  %v477_v21 = vpop.xlane.xlu0 %476  ;;  %v2664_v63 = vld [vmem:[%s2928_s14 + $0x3c] sm:$0x3] }
 0x2b6   : > { %v2029_v52 = vrot.slane %v477_v21, %v3660_v8 }
 0x2b7   : > { %2458 = vmatmul.mubr.msk.bf16.vlgmr.msra.gmra.mrb[8].mxu0 %vm1811_vm12, %v1787_v11  ;;  %v504_v11 = vpop.xlane.xlu1 %503 }
 0x2b8   : > { %v2065_v40 = vrot.slane %v504_v11, %v3660_v8  ;;  %v2116_v51 = vsel %vm677_vm3, %v2029_v52, %v2115_v7  ;;  %v532_v7 = vsel %vm438_vm11, %v2667_v6, 0.0 }
 0x2b9   : > { %v525_v61 = vpop.xlane.xlu0 %524 }
 0x2ba   : > { %v2124_v17 = vsel %vm680_vm4, %v2065_v40, %v2123_v15  ;;  %v2093_v62 = vrot.slane %v525_v61, %v3660_v8 }
 0x2bb   : > { %v459_v14 = vpop.xlane.xlu1 %458 }
 0x2bc   : > { %v2005_v41 = vrot.slane %v459_v14, %v3660_v8  ;;  %v2130_v3 = vsel %vm677_vm3, %v2093_v62, %v2129_v19 }
 0x2bd   : > { %v480_v1 = vpop.xlane.xlu0 %479 }
 0x2be   : > { %v3704_v35 = vsel %vm683_vm5, %v2005_v41, %v2110_v28  ;;  %v2033_v13 = vrot.slane %v480_v1, %v3660_v8 }
 0x2bf   : > { %v507_v38 = vpop.xlane.xlu1 %506 }
 0x2c0   : > { %v2069_v25 = vrot.slane %v507_v38, %v3660_v8  ;;  %v3709_v16 = vsel %vm680_vm4, %v2033_v13, %v2116_v51 }
 0x2c1   : > { %v528_v56 = vpop.xlane.xlu0 %527 }
 0x2c2   : > { %v3712_v24 = vsel %vm683_vm5, %v2069_v25, %v2124_v17  ;;  %v2097_v44 = vrot.slane %v528_v56, %v3660_v8 }
 0x2c4   : > { %v3716_v59 = vsel %vm680_vm4, %v2097_v44, %v2130_v3 }
 0x38a   : > { %v2459_v32 = vpop.f32.mrb[8].mxu0 }
 0x38b   : > { %v3721_v12 = vadd.f32 %v2459_v32, %v2358_v30  ;;  %v1852_v42 = vpop.f32.mrb[9].mxu0 }
 0x38c   : > { %v3723_v36 = vadd.f32 %v2358_v30, %v1852_v42  ;;  %v2460_v29 = vpop.f32.mrb[10].mxu0 }
 0x38d   : > { %v1869_v0 = vmul.f32 0.5, %v3721_v12  ;;  %v3726_v33 = vadd.f32 %v2460_v29, %v2358_v30  ;;  %v1855_v31 = vpop.f32.mrb[11].mxu0 }
 0x38e   : > { %v1867_v53 = vmul.f32 0.5, %v3723_v36  ;;  %v3729_v46 = vadd.f32 %v2358_v30, %v1855_v31 }
 0x38f   : > { %v1875_v9 = vmul.f32 1.442695, %v1869_v0  ;;  %v1870_v18 = vmul.f32 0.5, %v3726_v33 }
 0x390   : > { %v1871_v45 = vmul.f32 1.442695, %v1867_v53  ;;  %v1868_v50 = vmul.f32 0.5, %v3729_v46 }
 0x391   : > { %2628 = vpow2.f32 %v1875_v9  ;;  %v1877_v39 = vmul.f32 1.442695, %v1870_v18 }
 0x392   : > { %2630 = vpow2.f32 %v1871_v45  ;;  %v1873_v57 = vmul.f32 1.442695, %v1868_v50 }
 0x393   : > { %2632 = vpow2.f32 %v1877_v39 }
 0x394   : > { %2634 = vpow2.f32 %v1873_v57 }
 0x39b   : > { %v2629_v60 = vpop.eup %2628 }
 0x39c   : > { %v2631_v43 = vpop.eup %2630  ;;  %v1905_v54 = vmul.f32 %v2629_v60, %v3656_v23  ;;  %v529_v23 = vsel %vm438_vm11, %v2664_v63, 0.0  ;;  %v1881_v38 = vmul.f32 %v2629_v60, %v2629_v60 }
 0x39d   : > { %v3734_v26 = vpop.eup %2632  ;;  %v1903_v34 = vmul.f32 %v2631_v43, %v3652_v37  ;;  %v483_v37 = vpop.xlane.xlu0 %482  ;;  %v1879_v51 = vmul.f32 %v2631_v43, %v2631_v43 }
 0x39e   : > { %v1906_v22 = vmul.f32 %v3734_v26, %v3658_v49  ;;  %1915 = vrot.lane.b32.xlu0 %v1905_v54, %s2777_s29  ;;  %v2635_v4 = vpop.eup %2634  ;;  %v2666_v49 = vld [vmem:[%s2928_s14 + $0x2e] sm:$0x3]  ;;  %s383_s14 = sand.u32 1, %s2760_s10   ;;  %v2037_v61 = vrot.slane %v483_v37, %v3660_v8 }
 0x39f   : > { %v1904_v2 = vmul.f32 %v2635_v4, %v3654_v48  ;;  %v508_v55 = vsel %vm438_vm11, %v2666_v49, 0.0  ;;  %v462_v48 = vpop.xlane.xlu1 %461  ;;  %s2292_s21 = sshll.u32 %s383_s14, 5  ;;  %v1880_v62 = vmul.f32 %v2635_v4, %v2635_v4  ;;  %v2139_v3 = vsel %vm2138_vm13, %v3723_v36, %v1879_v51  ;;  %s3803_s22 = scalar_lea.sflag [#allocation4], %s383_s14 }
 0x3a0   : > { %1917 = vrot.lane.b32.xlu1 %v1906_v22, %s2777_s29  ;;  %v2009_v17 = vrot.slane %v462_v48, %v3660_v8  ;;  %v2118_v44 = vsel %vm683_vm5, %v2037_v61, %v3709_v16  ;;  %s385_s16 = scalar_lea.vmem [#allocation8], %s2292_s21  ;;  %v2141_v16 = vsel %vm2138_vm13, %v3721_v12, %v1881_v38 }
 0x3a1   : > { %v2140_v32 = vsel %vm2138_vm13, %v3729_v46, %v1880_v62  ;;  %s2176_s28 = sshll.u32 %s385_s16, 4  ;;  %s3791_s28 = int_to_ptr.vmem [resolvable:$true] %s2176_s28 }
 0x3a2   : > { %1911 = vrot.lane.b32.xlu0 %v1903_v34, %s2777_s29  ;;  %v2112_v13 = vsel %vm686_vm6, %v2009_v17, %v3704_v35  ;;  %s2698_s23 = scalar_lea.vmem %s3791_s28, 512  ;;  %p2705_p11 = scmp.lt.s32.totalorder %s3791_s28, %s2703_s17 }
 0x3a3   : > { %p2699_p12 = scmp.ne.s32.totalorder %s3791_s28, %s2698_s23 }
 0x3a4   : > { %1913 = vrot.lane.b32.xlu1 %v1904_v2, %s2777_s29  ;;  %s2704_s29 = scalar_lea.vmem %s2703_s17, 1024 }
 0x3a5   : > { %p2700_p7 = pnand %p2699_p12, %p3875_p0  ;;  %p2706_p13 = scmp.lt.s32.totalorder %s2704_s29, %s2698_s23 }
 0x3a7   : > { %p2701_p8 = pneg %p2700_p7  ;;  %p2707_p1 = por %p2706_p13, %p2705_p11 }
 0x3a9   : > { %p2708_p2 = pnand %p2707_p1, %p2701_p8 }
 0x3c1   : > { %530 = vadd.xlane.f32.xlu0 %v529_v23 }
 0x3c5   : > { %485 = vadd.xlane.f32.xlu0 %v484_v5 }
 0x3c8   : > { %509 = vadd.xlane.f32.xlu1 %v508_v55 }
 0x3c9   : > { %533 = vadd.xlane.f32.xlu0 %v532_v7 }
 0x410   : > { %v1916_v15 = vpop.permute.xlu0 %1915 }
 0x411   : > { %v1925_v28 = vadd.f32 %v1916_v15, %v3721_v12 }
 0x412   : > { %v1918_v27 = vpop.permute.xlu1 %1917 }
 0x413   : > { %v1926_v21 = vadd.f32 %v1918_v27, %v3726_v33 }
 0x414   : > { %v1912_v58 = vpop.permute.xlu0 %1911 }
 0x415   : > { %v1923_v47 = vadd.f32 %v1912_v58, %v3723_v36 }
 0x416   : > { %v1914_v20 = vpop.permute.xlu1 %1913 }
 0x417   : > { %v1924_v19 = vadd.f32 %v1914_v20, %v3729_v46  ;;  %1931 = vrot.lane.b32.xlu1 %v1923_v47, %s2778_s26  ;;  %v1882_v46 = vmul.f32 %v3734_v26, %v3734_v26 }
 0x419   : > { %1933 = vrot.lane.b32.xlu0 %v1924_v19, %s2778_s26 }
 0x41b   : > { %1935 = vrot.lane.b32.xlu1 %v1925_v28, %s2778_s26 }
 0x41f   : > { %1937 = vrot.lane.b32.xlu1 %v1926_v21, %s2778_s26 }
 0x44e   : > { %v531_v11 = vpop.xlane.xlu0 %530 }
 0x44f   : > { %v2101_v35 = vrot.slane %v531_v11, %v3660_v8 }
 0x451   : > { %v2132_v57 = vsel %vm683_vm5, %v2101_v35, %v3716_v59 }
 0x452   : > { %v486_v52 = vpop.xlane.xlu0 %485 }
 0x453   : > { %v2041_v41 = vrot.slane %v486_v52, %v3660_v8 }
 0x455   : > { %v510_v40 = vpop.xlane.xlu1 %509  ;;  %v2119_v36 = vsel %vm686_vm6, %v2041_v41, %v2118_v44 }
 0x456   : > { %v534_v14 = vpop.xlane.xlu0 %533  ;;  %v2073_v25 = vrot.slane %v510_v40, %v3660_v8 }
 0x457   : > { %v2105_v18 = vrot.slane %v534_v14, %v3660_v8  ;;  %v2142_v8 = vsel %vm2138_vm13, %v3726_v33, %v1882_v46 }
 0x458   : > { %v2126_v9 = vsel %vm686_vm6, %v2073_v25, %v3712_v24 }
 0x459   : > { %v2133_v60 = vsel %vm686_vm6, %v2105_v18, %v2132_v57 }
 0x489   : > { %v1932_v1 = vpop.permute.xlu1 %1931 }
 0x48a   : > { %v2144_v56 = vsel %vm2143_vm14, %v2139_v3, %v1932_v1 }
 0x48b   : > { %v2149_v30 = vsel %vm2148_vm15, %v2144_v56, %v2112_v13  ;;  %v1934_v42 = vpop.permute.xlu0 %1933 }
 0x48c   : > { %v2154_v29 = vsel %vm2153_vm0, %v2149_v30, 0.0  ;;  %v2145_v0 = vsel %vm2143_vm14, %v2140_v32, %v1934_v42 }
 0x48d   : > { %2158 = vst [vmem:[%s385_s16] sm:$0xff] %v2154_v29  ;;  %v2150_v31 = vsel %vm2148_vm15, %v2145_v0, %v2119_v36  ;;  %v1936_v53 = vpop.permute.xlu1 %1935 }
 0x48e   : > { %v2155_v45 = vsel %vm2153_vm0, %v2150_v31, 0.0  ;;  %v2146_v50 = vsel %vm2143_vm14, %v2141_v16, %v1936_v53 }
 0x48f   : > { %2159 = vst [vmem:[%s385_s16 + $0x8] sm:$0xff] %v2155_v45  ;;  %v2151_v39 = vsel %vm2148_vm15, %v2146_v50, %v2126_v9 }
 0x490   : > { %v2156_v12 = vsel %vm2153_vm0, %v2151_v39, 0.0 }
 0x491   : > { %2160 = vst [vmem:[%s385_s16 + $0x10] sm:$0xff] %v2156_v12  ;;  %v1938_v24 = vpop.permute.xlu1 %1937 }
 0x492   : > { %v2147_v43 = vsel %vm2143_vm14, %v2142_v8, %v1938_v24 }
 0x493   : > { %v2152_v54 = vsel %vm2148_vm15, %v2147_v43, %v2133_v60 }
 0x494   : > { %v2157_v59 = vsel %vm2153_vm0, %v2152_v54, 0.0 }
 0x495   : > { %2161 = vst [vmem:[%s385_s16 + $0x18] sm:$0xff] %v2157_v59 }
 0x496   : > { %2711 = shalt.err (!%p2708_p2)
}
 0x497   : > { %s2712_s26 = scalar_lea.hbm %s3798_s0, 512  ;;  %s2716_s16 = scalar_lea.hbm %s3853_s9, 1024 }
 0x498   : > { %p2713_p3 = scmp.ne.s32.totalorder %s3798_s0, %s2712_s26  ;;  %p2717_p5 = scmp.lt.u32.totalorder %s3798_s0, %s3853_s9 }
 0x499   : > { %p2718_p6 = scmp.lt.u32.totalorder %s2716_s16, %s2712_s26  ;;  %p2720_p12 = scmp.lt.u32.totalorder %s2712_s26, %s3798_s0 }
 0x49a   : > { %p2714_p4 = pnand %p2713_p3, %p3875_p0 }
 0x49b   : > { %p2719_p10 = por %p2718_p6, %p2717_p5 }
 0x49c   : > { %p2715_p9 = pneg %p2714_p4 }
 0x49d   : > { %p2721_p7 = por %p2720_p12, %p2719_p10 }
 0x49f   : > { %p2722_p8 = pnand %p2721_p7, %p2715_p9 }
 0x4a1   : > { %2725 = shalt.err (!%p2722_p8)
}
 0x4a2   : > { %s2780_s24 = smov 128   ;;  %s2781_s23 = smov 8  }
 0x4a3   : > { %2469 = dma.vmem_to_hbm [thread:$0]  (%p3875_p0), %s3791_s28, 512, %s3798_s0, %s3803_s22, %s2780_s24, %s2780_s24, %s2781_s23  }
 0x4a4 PF: > { %p2486_p11 = scmp.ge.s32.totalorder %s2768_s12, 2  ;;  %s2191_s25 = sand.u32 1, %s2756_s30  }
 0x4a5   : > { %p3876_p13 = scmp.ne.s32.totalorder %s3862_s20, 0  ;;  %s2192_s17 = scalar_lea.sflag [#allocation4], %s2191_s25 }
 0x4a7   : > { %p2479_p1 = pnand %p2486_p11, %p3876_p13 }
 0x4a9   : > { %2751 = dma.done.wait (!%p2479_p1), %s2192_s17, 512  }
 0x4aa   : > { %2753 = vsyncadd (!%p2479_p1), %s2192_s17, 4294966784  ;;  %p21_p2 = scmp.ge.s32.totalorder %s2857_s15, 4   ;;  %s3877_s30 = smov %s2760_s10 }
 0x4ab   : > { %s3878_s10 = smov %s2764_s11  ;;  %s3879_s11 = smov %s2868_s18 }
 0x4ac   : > { %s3880_s12 = smov %s2857_s15  ;;  %23 = sbr.rel (!%p21_p2) target bundleno = 7 (0x7), region = 106 }
 0x4b3   :  { %2197 = vsyncpa [#allocation4], 1 }
 0x4b4   :  { %2199 = vsyncpa [#allocation4 + $0x1], 1 }
 0x4b5   :  { %2200 = vsyncpa [#allocation5], 1 }
 0x4b6   :  { %2202 = vsyncpa [#allocation5 + $0x1], 1 }
 0x4b7   :  { %2203 = vsyncpa [#allocation7], 1 }

</bundles_post_ra>
